<compile_context>
chip_gen: v7x
topology: tpu7x:2x2x1
jax: 0.10.0
libtpu: 0.0.40
codegen_flags: <defaults>
</compile_context>

<pallas_src>
import functools
import math

import jax
import jax.numpy as jnp
from jax.experimental import pallas as pl
from jax.experimental.pallas import tpu as pltpu

_BF16 = jnp.bfloat16


def _layernorm(x, gamma, beta, eps=1e-5):
    mu = jnp.mean(x, axis=-1, keepdims=True)
    var = jnp.mean((x - mu) ** 2, axis=-1, keepdims=True)
    return (x - mu) * jax.lax.rsqrt(var + eps) * gamma + beta


def transformer_block_kernel(
    x_ref,               # (1, S, D)  f32
    g1_ref, b1_ref,      # (1, D)     f32   LayerNorm 1
    wqkv_ref, bqkv_ref,  # (D, 2*H*dk + H*D) bf16, (1, same) f32 (scale folded into Q cols)
    wo_ref, bo_ref,      # (H*D, D)  bf16, (1, D)   f32
    g2_ref, b2_ref,      # (1, D)     f32   LayerNorm 2
    w1_ref, bm1_ref,     # (D, F*D)  bf16, (1, F*D) f32
    w2_ref, bm2_ref,     # (F*D, D)  bf16, (1, D)   f32
    o_ref,               # (1, S, D)  f32
    *, n_heads, d_key, mlp_chunk,
):
    bf16 = wqkv_ref.dtype
    x = x_ref[0]                                   # (S, D) f32
    seq_len, d_model = x.shape

    # ---- LayerNorm 1 (f32 elementwise) ----
    xn_b = _layernorm(x, g1_ref[...], b1_ref[...]).astype(bf16)

    # ---- fused Q/K/V projection: one lane-dense MXU matmul, f32 accumulate ----
    qkv = jnp.dot(xn_b, wqkv_ref[...],
                  preferred_element_type=jnp.float32) + bqkv_ref[...]
    qkv_b = qkv.astype(bf16)                       # single cast, reused by every head

    k_off = n_heads * d_key
    v_off = 2 * n_heads * d_key

    # ---- per-head attention; head outputs lane-concatenated, ONE Wo matmul ----
    # TODO(synk): at large S, add a sequence-tile grid axis (query "parallel",
    # KV "arbitrary") with online softmax instead of full (S, S) scores; at large
    # D/H, tile the V/Wo weights over a head axis ("arbitrary", pl.when
    # init/finalize) to stay under v7x's 64 MiB VMEM (~48 MiB weight budget).
    heads = []
    for h in range(n_heads):
        qh = qkv_b[:, h * d_key:(h + 1) * d_key]                    # scale pre-folded
        kh = qkv_b[:, k_off + h * d_key:k_off + (h + 1) * d_key]
        vh = qkv_b[:, v_off + h * d_model:v_off + (h + 1) * d_model]
        s = jnp.einsum("qd,kd->qk", qh, kh,
                       preferred_element_type=jnp.float32)          # (S, S) f32
        s = s - jnp.max(s, axis=-1, keepdims=True)
        p = jnp.exp(s)
        # approx reciprocal (EUP slot) + bf16 probabilities: fine for inference
        # tolerance; revert to exact divide / f32 p if training-grade accuracy is needed.
        p = p * pl.reciprocal(jnp.sum(p, axis=-1, keepdims=True), approx=True)
        heads.append(jnp.dot(p.astype(bf16), vh,
                             preferred_element_type=jnp.float32))   # (S, D) f32
    cat = jnp.concatenate(heads, axis=-1).astype(bf16)              # (S, H*D)
    attn = jnp.dot(cat, wo_ref[...],
                   preferred_element_type=jnp.float32) + bo_ref[...]

    x1 = x + attn                                                   # residual 1

    # ---- LayerNorm 2 + MLP (SiLU), f32 elementwise / accumulation ----
    xn2_b = _layernorm(x1, g2_ref[...], b2_ref[...]).astype(bf16)
    hidden = w1_ref.shape[-1]
    n_chunks = hidden // mlp_chunk

    if n_chunks == 1:                                               # toy / small hidden
        hmid = jnp.dot(xn2_b, w1_ref[...],
                       preferred_element_type=jnp.float32) + bm1_ref[...]
        hmid = hmid * jax.nn.sigmoid(hmid)                          # SiLU in f32
        mlp = jnp.dot(hmid.astype(bf16), w2_ref[...],
                      preferred_element_type=jnp.float32)
    else:
        def chunk_body(c, acc):
            c0 = pl.multiple_of(c * mlp_chunk, 128)
            hm = jnp.dot(xn2_b, w1_ref[:, pl.ds(c0, mlp_chunk)],
                         preferred_element_type=jnp.float32) + bm1_ref[:, pl.ds(c0, mlp_chunk)]
            hm = hm * jax.nn.sigmoid(hm)
            return acc + jnp.dot(hm.astype(bf16), w2_ref[pl.ds(c0, mlp_chunk), :],
                                 preferred_element_type=jnp.float32)
        mlp = jax.lax.fori_loop(0, n_chunks, chunk_body,
                                jnp.zeros((seq_len, d_model), jnp.float32))
    mlp = mlp + bm2_ref[...]

    # TODO(synk): with D < 128 this is one lane-masked store; at this size (8x32 f32,
    # 1 KiB total) a (1, S*D) slab would NOT be denser (1x256 -> two 1/8-sublane
    # stores), so the reshape is skipped.  At real scale, pad/tile D to a multiple
    # of 128 (or present a lane-dense output slab) instead.
    o_ref[0] = (x1 + mlp).astype(o_ref.dtype)                       # residual 2


def _pick_mlp_chunk(hidden):
    if hidden <= 1024:
        return hidden
    for c in (1024, 512, 256, 128):
        if hidden % c == 0:
            return c
    # TODO(synk): pad hidden to a 128 multiple for very large non-aligned sizes.
    return hidden


def transformer_block(x, params, n_heads, d_key):
    """x: (B, S, D) float32.  params: dict of f32 weights (see init_params)."""
    B, S, D = x.shape
    hidden = params["w1"].shape[-1]
    mlp_chunk = _pick_mlp_chunk(hidden)
    scale = 1.0 / math.sqrt(float(d_key))

    # Pack Q/K/V into one lane-dense weight; fold the attention scale into the Q
    # columns (free at pack time).  Matmul operands bf16, biases / LN params f32.
    wqkv = jnp.concatenate(
        [params["wq"] * scale, params["wk"], params["wv"]], axis=1).astype(_BF16)
    bqkv = jnp.concatenate(
        [params["bq"] * scale, params["bk"], params["bv"]], axis=1)

    flat = [
        params["g1"], params["b1"],
        wqkv, bqkv,
        params["wo"].astype(_BF16), params["bo"],
        params["g2"], params["b2"],
        params["w1"].astype(_BF16), params["bm1"],
        params["w2"].astype(_BF16), params["bm2"],
    ]

    kernel = functools.partial(transformer_block_kernel,
                               n_heads=n_heads, d_key=d_key, mlp_chunk=mlp_chunk)

    def call(single_buffer_weights):
        def resident_spec(a):
            # Whole (small) weight resident in VMEM; block index invariant across
            # the batch grid.  Buffered(1) avoids double-buffering invariant
            # operands (halves weight VMEM -- decisive on v7x's 64 MiB/TC).
            nd = a.ndim
            kwargs = {}
            if single_buffer_weights:
                kwargs["pipeline_mode"] = pl.Buffered(1)
            return pl.BlockSpec(a.shape, lambda b, _nd=nd: (0,) * _nd, **kwargs)

        return pl.pallas_call(
            kernel,
            out_shape=jax.ShapeDtypeStruct((B, S, D), x.dtype),
            grid=(B,),
            in_specs=[pl.BlockSpec((1, S, D), lambda b: (b, 0, 0))]
                     + [resident_spec(a) for a in flat],
            out_specs=pl.BlockSpec((1, S, D), lambda b: (b, 0, 0)),
            compiler_params=pltpu.CompilerParams(
                # "parallel" batch axis: both v7x TensorCores get one batch each;
                # on single-TC v5e/v6e it is a short serial loop.
                dimension_semantics=("parallel",),
                vmem_limit_bytes=32 * 1024 * 1024,   # fits every generation incl. v7x
            ),
        )(x, *flat)

    try:
        return call(single_buffer_weights=True)
    except Exception:
        # TODO(synk): drop fallback once pl.Buffered(1) support is guaranteed on
        # the deployed jax version; correctness is identical either way.
        return call(single_buffer_weights=False)


def init_params(key, d_model, d_key, n_heads, mlp_factor=4):
    """PyTorch-style uniform(-1/sqrt(fan_in), 1/sqrt(fan_in)) init, pre-fused layout."""
    keys = list(jax.random.split(key, 3 * n_heads + 3))
    ki = iter(keys)

    def lin(k, fan_in, fan_out):
        bound = 1.0 / math.sqrt(fan_in)
        kw, kb = jax.random.split(k)
        w = jax.random.uniform(kw, (fan_in, fan_out), jnp.float32, -bound, bound)
        b = jax.random.uniform(kb, (fan_out,), jnp.float32, -bound, bound)
        return w, b

    wq, bq, wk, bk, wv, bv = [], [], [], [], [], []
    for _ in range(n_heads):
        w, b = lin(next(ki), d_model, d_key); wq.append(w); bq.append(b)
        w, b = lin(next(ki), d_model, d_key); wk.append(w); bk.append(b)
        w, b = lin(next(ki), d_model, d_model); wv.append(w); bv.append(b)
    wo, bo = lin(next(ki), n_heads * d_model, d_model)
    w1, bm1 = lin(next(ki), d_model, mlp_factor * d_model)
    w2, bm2 = lin(next(ki), mlp_factor * d_model, d_model)

    return {
        "g1": jnp.ones((1, d_model), jnp.float32),
        "b1": jnp.zeros((1, d_model), jnp.float32),
        "wq": jnp.concatenate(wq, axis=1), "bq": jnp.concatenate(bq)[None, :],
        "wk": jnp.concatenate(wk, axis=1), "bk": jnp.concatenate(bk)[None, :],
        "wv": jnp.concatenate(wv, axis=1), "bv": jnp.concatenate(bv)[None, :],
        "wo": wo, "bo": bo[None, :],                      # wo: (H*D, D)
        "g2": jnp.ones((1, d_model), jnp.float32),
        "b2": jnp.zeros((1, d_model), jnp.float32),
        "w1": w1, "bm1": bm1[None, :],
        "w2": w2, "bm2": bm2[None, :],
    }


def _ref_forward(x, p, n_heads, d_key):
    """Pure-JAX f32 reference (same param layout)."""
    def ln(v, g, b, eps=1e-5):
        mu = v.mean(-1, keepdims=True)
        var = ((v - mu) ** 2).mean(-1, keepdims=True)
        return (v - mu) / jnp.sqrt(var + eps) * g + b

    D = x.shape[-1]
    xn = ln(x, p["g1"], p["b1"])
    q = xn @ p["wq"] + p["bq"]
    k = xn @ p["wk"] + p["bk"]
    v = xn @ p["wv"] + p["bv"]
    heads = []
    for h in range(n_heads):
        qh = q[..., h * d_key:(h + 1) * d_key]
        kh = k[..., h * d_key:(h + 1) * d_key]
        vh = v[..., h * D:(h + 1) * D]
        s = jnp.einsum("bqd,bkd->bqk", qh, kh) / math.sqrt(d_key)
        pr = jax.nn.softmax(s, axis=-1)
        heads.append(jnp.einsum("bqk,bkd->bqd", pr, vh))
    cat = jnp.concatenate(heads, axis=-1)
    x1 = x + cat @ p["wo"] + p["bo"]
    xn2 = ln(x1, p["g2"], p["b2"])
    hmid = xn2 @ p["w1"] + p["bm1"]
    hmid = hmid * jax.nn.sigmoid(hmid)
    return x1 + hmid @ p["w2"] + p["bm2"]


if __name__ == "__main__":
    B, S = 2, 8
    d_model, d_key, n_heads, mlp_factor = 32, 16, 2, 4

    key = jax.random.PRNGKey(0)
    kx, kp = jax.random.split(key)
    x = jax.random.normal(kx, (B, S, d_model), jnp.float32)
    params = init_params(kp, d_model, d_key, n_heads, mlp_factor)

    out = jax.block_until_ready(transformer_block(x, params, n_heads, d_key))
    assert out.shape == (B, S, d_model) and out.dtype == jnp.float32
    assert bool(jnp.all(jnp.isfinite(out)))

    ref = _ref_forward(x, params, n_heads, d_key)
    assert bool(jnp.allclose(out, ref, atol=5e-2, rtol=5e-2)), (
        "max abs err %.4g" % float(jnp.max(jnp.abs(out - ref))))
    print("KERNEL_OK")
</pallas_src>

<mosaic_0001>
module attributes {stable_mosaic.version = 11 : i64} {
  func.func @transformer_block_kernel(%arg0: i32, %arg1: memref<1x8x32xf32, #tpu.memory_space<vmem>>, %arg2: memref<1x32xf32, #tpu.memory_space<vmem>>, %arg3: memref<1x32xf32, #tpu.memory_space<vmem>>, %arg4: memref<32x128xbf16, #tpu.memory_space<vmem>>, %arg5: memref<1x128xf32, #tpu.memory_space<vmem>>, %arg6: memref<64x32xbf16, #tpu.memory_space<vmem>>, %arg7: memref<1x32xf32, #tpu.memory_space<vmem>>, %arg8: memref<1x32xf32, #tpu.memory_space<vmem>>, %arg9: memref<1x32xf32, #tpu.memory_space<vmem>>, %arg10: memref<32x128xbf16, #tpu.memory_space<vmem>>, %arg11: memref<1x128xf32, #tpu.memory_space<vmem>>, %arg12: memref<128x32xbf16, #tpu.memory_space<vmem>>, %arg13: memref<1x32xf32, #tpu.memory_space<vmem>>, %arg14: memref<1x8x32xf32, #tpu.memory_space<vmem>>) attributes {dimension_semantics = [#tpu.dimension_semantics<parallel>], iteration_bounds = array<i64: 2>, scalar_prefetch = 0 : i64, scratch_operands = 0 : i64, tpu.core_type = #tpu.core_type<tc>, window_params = [{transform_indices = @transform_0, window_bounds = array<i64: 1, 8, 32>}, {pipeline_mode = #tpu.pipeline_mode<synchronous>, transform_indices = @transform_1, window_bounds = array<i64: 1, 32>}, {pipeline_mode = #tpu.pipeline_mode<synchronous>, transform_indices = @transform_2, window_bounds = array<i64: 1, 32>}, {pipeline_mode = #tpu.pipeline_mode<synchronous>, transform_indices = @transform_3, window_bounds = array<i64: 32, 128>}, {pipeline_mode = #tpu.pipeline_mode<synchronous>, transform_indices = @transform_4, window_bounds = array<i64: 1, 128>}, {pipeline_mode = #tpu.pipeline_mode<synchronous>, transform_indices = @transform_5, window_bounds = array<i64: 64, 32>}, {pipeline_mode = #tpu.pipeline_mode<synchronous>, transform_indices = @transform_6, window_bounds = array<i64: 1, 32>}, {pipeline_mode = #tpu.pipeline_mode<synchronous>, transform_indices = @transform_7, window_bounds = array<i64: 1, 32>}, {pipeline_mode = #tpu.pipeline_mode<synchronous>, transform_indices = @transform_8, window_bounds = array<i64: 1, 32>}, {pipeline_mode = #tpu.pipeline_mode<synchronous>, transform_indices = @transform_9, window_bounds = array<i64: 32, 128>}, {pipeline_mode = #tpu.pipeline_mode<synchronous>, transform_indices = @transform_10, window_bounds = array<i64: 1, 128>}, {pipeline_mode = #tpu.pipeline_mode<synchronous>, transform_indices = @transform_11, window_bounds = array<i64: 128, 32>}, {pipeline_mode = #tpu.pipeline_mode<synchronous>, transform_indices = @transform_12, window_bounds = array<i64: 1, 32>}, {transform_indices = @transform_13, window_bounds = array<i64: 1, 8, 32>}]} {
    %c0 = arith.constant 0 : index
    %c0_0 = arith.constant 0 : index
    %c0_1 = arith.constant 0 : index
    %0 = vector.load %arg1[%c0, %c0_0, %c0_1] : memref<1x8x32xf32, #tpu.memory_space<vmem>>, vector<1x8x32xf32>
    %1 = vector.shape_cast %0 : vector<1x8x32xf32> to vector<8x32xf32>
    %c0_2 = arith.constant 0 : index
    %c0_3 = arith.constant 0 : index
    %2 = vector.load %arg2[%c0_2, %c0_3] : memref<1x32xf32, #tpu.memory_space<vmem>>, vector<1x32xf32>
    %c0_4 = arith.constant 0 : index
    %c0_5 = arith.constant 0 : index
    %3 = vector.load %arg3[%c0_4, %c0_5] : memref<1x32xf32, #tpu.memory_space<vmem>>, vector<1x32xf32>
    %cst = arith.constant dense<0.000000e+00> : vector<8xf32>
    %4 = vector.multi_reduction <add>, %1, %cst [1] : vector<8x32xf32> to vector<8xf32>
    %5 = vector.shape_cast %4 : vector<8xf32> to vector<8x1xf32>
    %cst_6 = arith.constant 3.200000e+01 : f32
    %6 = vector.broadcast %cst_6 : f32 to vector<8x1xf32>
    %7 = arith.divf %5, %6 : vector<8x1xf32>
    %8 = vector.broadcast %7 : vector<8x1xf32> to vector<8x32xf32>
    %9 = arith.subf %1, %8 : vector<8x32xf32>
    %10 = arith.mulf %9, %9 : vector<8x32xf32>
    %cst_7 = arith.constant dense<0.000000e+00> : vector<8xf32>
    %11 = vector.multi_reduction <add>, %10, %cst_7 [1] : vector<8x32xf32> to vector<8xf32>
    %12 = vector.shape_cast %11 : vector<8xf32> to vector<8x1xf32>
    %cst_8 = arith.constant 3.200000e+01 : f32
    %13 = vector.broadcast %cst_8 : f32 to vector<8x1xf32>
    %14 = arith.divf %12, %13 : vector<8x1xf32>
    %15 = vector.broadcast %7 : vector<8x1xf32> to vector<8x32xf32>
    %16 = arith.subf %1, %15 : vector<8x32xf32>
    %cst_9 = arith.constant 9.99999974E-6 : f32
    %17 = vector.broadcast %cst_9 : f32 to vector<8x1xf32>
    %18 = arith.addf %14, %17 : vector<8x1xf32>
    %19 = math.rsqrt %18 : vector<8x1xf32>
    %20 = vector.broadcast %19 : vector<8x1xf32> to vector<8x32xf32>
    %21 = arith.mulf %16, %20 : vector<8x32xf32>
    %22 = vector.broadcast %2 : vector<1x32xf32> to vector<8x32xf32>
    %23 = arith.mulf %21, %22 : vector<8x32xf32>
    %24 = vector.broadcast %3 : vector<1x32xf32> to vector<8x32xf32>
    %25 = arith.addf %23, %24 : vector<8x32xf32>
    %26 = arith.truncf %25 : vector<8x32xf32> to vector<8x32xbf16>
    %c0_10 = arith.constant 0 : index
    %c0_11 = arith.constant 0 : index
    %27 = vector.load %arg4[%c0_10, %c0_11] : memref<32x128xbf16, #tpu.memory_space<vmem>>, vector<32x128xbf16>
    %cst_12 = arith.constant dense<0.000000e+00> : vector<8x128xf32>
    %28 = tpu.matmul %26, %27, %cst_12 {dimension_numbers = #tpu.dot_dimension_numbers<[1], [0], [0], [1], [0, 0, 1, 1], [], []>} : vector<8x32xbf16>, vector<32x128xbf16>, vector<8x128xf32> -> vector<8x128xf32>
    %c0_13 = arith.constant 0 : index
    %c0_14 = arith.constant 0 : index
    %29 = vector.load %arg5[%c0_13, %c0_14] : memref<1x128xf32, #tpu.memory_space<vmem>>, vector<1x128xf32>
    %30 = vector.broadcast %29 : vector<1x128xf32> to vector<8x128xf32>
    %31 = arith.addf %28, %30 : vector<8x128xf32>
    %32 = arith.truncf %31 : vector<8x128xf32> to vector<8x128xbf16>
    %33 = vector.extract_strided_slice %32 {offsets = [0, 0], sizes = [8, 16], strides = [1, 1]} : vector<8x128xbf16> to vector<8x16xbf16>
    %34 = vector.extract_strided_slice %32 {offsets = [0, 32], sizes = [8, 16], strides = [1, 1]} : vector<8x128xbf16> to vector<8x16xbf16>
    %35 = vector.extract_strided_slice %32 {offsets = [0, 64], sizes = [8, 32], strides = [1, 1]} : vector<8x128xbf16> to vector<8x32xbf16>
    "tpu.trace_start"() <{level = 10 : i32, message = "qd,kd->qk"}> : () -> ()
    %cst_15 = arith.constant dense<0.000000e+00> : vector<8x8xf32>
    %36 = tpu.matmul %33, %34, %cst_15 {dimension_numbers = #tpu.dot_dimension_numbers<[1], [1], [0], [0], [0, 0, 1, 0], [], []>} : vector<8x16xbf16>, vector<8x16xbf16>, vector<8x8xf32> -> vector<8x8xf32>
    "tpu.trace_stop"() : () -> ()
    %cst_16 = arith.constant dense<0xFF800000> : vector<8xf32>
    %37 = vector.multi_reduction <maximumf>, %36, %cst_16 [1] : vector<8x8xf32> to vector<8xf32>
    %38 = vector.shape_cast %37 : vector<8xf32> to vector<8x1xf32>
    %39 = vector.broadcast %38 : vector<8x1xf32> to vector<8x8xf32>
    %40 = arith.subf %36, %39 : vector<8x8xf32>
    %41 = math.exp %40 : vector<8x8xf32>
    %cst_17 = arith.constant dense<0.000000e+00> : vector<8xf32>
    %42 = vector.multi_reduction <add>, %41, %cst_17 [1] : vector<8x8xf32> to vector<8xf32>
    %43 = vector.shape_cast %42 : vector<8xf32> to vector<8x1xf32>
    %44 = tpu.reciprocal %43 {approx = true} : vector<8x1xf32> -> vector<8x1xf32>
    %45 = vector.broadcast %44 : vector<8x1xf32> to vector<8x8xf32>
    %46 = arith.mulf %41, %45 : vector<8x8xf32>
    %47 = arith.truncf %46 : vector<8x8xf32> to vector<8x8xbf16>
    %cst_18 = arith.constant dense<0.000000e+00> : vector<8x32xf32>
    %48 = tpu.matmul %47, %35, %cst_18 {dimension_numbers = #tpu.dot_dimension_numbers<[1], [0], [0], [1], [0, 0, 1, 1], [], []>} : vector<8x8xbf16>, vector<8x32xbf16>, vector<8x32xf32> -> vector<8x32xf32>
    %49 = vector.extract_strided_slice %32 {offsets = [0, 16], sizes = [8, 16], strides = [1, 1]} : vector<8x128xbf16> to vector<8x16xbf16>
    %50 = vector.extract_strided_slice %32 {offsets = [0, 48], sizes = [8, 16], strides = [1, 1]} : vector<8x128xbf16> to vector<8x16xbf16>
    %51 = vector.extract_strided_slice %32 {offsets = [0, 96], sizes = [8, 32], strides = [1, 1]} : vector<8x128xbf16> to vector<8x32xbf16>
    "tpu.trace_start"() <{level = 10 : i32, message = "qd,kd->qk"}> : () -> ()
    %cst_19 = arith.constant dense<0.000000e+00> : vector<8x8xf32>
    %52 = tpu.matmul %49, %50, %cst_19 {dimension_numbers = #tpu.dot_dimension_numbers<[1], [1], [0], [0], [0, 0, 1, 0], [], []>} : vector<8x16xbf16>, vector<8x16xbf16>, vector<8x8xf32> -> vector<8x8xf32>
    "tpu.trace_stop"() : () -> ()
    %cst_20 = arith.constant dense<0xFF800000> : vector<8xf32>
    %53 = vector.multi_reduction <maximumf>, %52, %cst_20 [1] : vector<8x8xf32> to vector<8xf32>
    %54 = vector.shape_cast %53 : vector<8xf32> to vector<8x1xf32>
    %55 = vector.broadcast %54 : vector<8x1xf32> to vector<8x8xf32>
    %56 = arith.subf %52, %55 : vector<8x8xf32>
    %57 = math.exp %56 : vector<8x8xf32>
    %cst_21 = arith.constant dense<0.000000e+00> : vector<8xf32>
    %58 = vector.multi_reduction <add>, %57, %cst_21 [1] : vector<8x8xf32> to vector<8xf32>
    %59 = vector.shape_cast %58 : vector<8xf32> to vector<8x1xf32>
    %60 = tpu.reciprocal %59 {approx = true} : vector<8x1xf32> -> vector<8x1xf32>
    %61 = vector.broadcast %60 : vector<8x1xf32> to vector<8x8xf32>
    %62 = arith.mulf %57, %61 : vector<8x8xf32>
    %63 = arith.truncf %62 : vector<8x8xf32> to vector<8x8xbf16>
    %cst_22 = arith.constant dense<0.000000e+00> : vector<8x32xf32>
    %64 = tpu.matmul %63, %51, %cst_22 {dimension_numbers = #tpu.dot_dimension_numbers<[1], [0], [0], [1], [0, 0, 1, 1], [], []>} : vector<8x8xbf16>, vector<8x32xbf16>, vector<8x32xf32> -> vector<8x32xf32>
    %65 = tpu.concatenate %48, %64 in 1 : vector<8x32xf32>, vector<8x32xf32> -> vector<8x64xf32>
    %66 = arith.truncf %65 : vector<8x64xf32> to vector<8x64xbf16>
    %c0_23 = arith.constant 0 : index
    %c0_24 = arith.constant 0 : index
    %67 = vector.load %arg6[%c0_23, %c0_24] : memref<64x32xbf16, #tpu.memory_space<vmem>>, vector<64x32xbf16>
    %cst_25 = arith.constant dense<0.000000e+00> : vector<8x32xf32>
    %68 = tpu.matmul %66, %67, %cst_25 {dimension_numbers = #tpu.dot_dimension_numbers<[1], [0], [0], [1], [0, 0, 1, 1], [], []>} : vector<8x64xbf16>, vector<64x32xbf16>, vector<8x32xf32> -> vector<8x32xf32>
    %c0_26 = arith.constant 0 : index
    %c0_27 = arith.constant 0 : index
    %69 = vector.load %arg7[%c0_26, %c0_27] : memref<1x32xf32, #tpu.memory_space<vmem>>, vector<1x32xf32>
    %70 = vector.broadcast %69 : vector<1x32xf32> to vector<8x32xf32>
    %71 = arith.addf %68, %70 : vector<8x32xf32>
    %72 = arith.addf %1, %71 : vector<8x32xf32>
    %c0_28 = arith.constant 0 : index
    %c0_29 = arith.constant 0 : index
    %73 = vector.load %arg8[%c0_28, %c0_29] : memref<1x32xf32, #tpu.memory_space<vmem>>, vector<1x32xf32>
    %c0_30 = arith.constant 0 : index
    %c0_31 = arith.constant 0 : index
    %74 = vector.load %arg9[%c0_30, %c0_31] : memref<1x32xf32, #tpu.memory_space<vmem>>, vector<1x32xf32>
    %cst_32 = arith.constant dense<0.000000e+00> : vector<8xf32>
    %75 = vector.multi_reduction <add>, %72, %cst_32 [1] : vector<8x32xf32> to vector<8xf32>
    %76 = vector.shape_cast %75 : vector<8xf32> to vector<8x1xf32>
    %cst_33 = arith.constant 3.200000e+01 : f32
    %77 = vector.broadcast %cst_33 : f32 to vector<8x1xf32>
    %78 = arith.divf %76, %77 : vector<8x1xf32>
    %79 = vector.broadcast %78 : vector<8x1xf32> to vector<8x32xf32>
    %80 = arith.subf %72, %79 : vector<8x32xf32>
    %81 = arith.mulf %80, %80 : vector<8x32xf32>
    %cst_34 = arith.constant dense<0.000000e+00> : vector<8xf32>
    %82 = vector.multi_reduction <add>, %81, %cst_34 [1] : vector<8x32xf32> to vector<8xf32>
    %83 = vector.shape_cast %82 : vector<8xf32> to vector<8x1xf32>
    %cst_35 = arith.constant 3.200000e+01 : f32
    %84 = vector.broadcast %cst_35 : f32 to vector<8x1xf32>
    %85 = arith.divf %83, %84 : vector<8x1xf32>
    %86 = vector.broadcast %78 : vector<8x1xf32> to vector<8x32xf32>
    %87 = arith.subf %72, %86 : vector<8x32xf32>
    %cst_36 = arith.constant 9.99999974E-6 : f32
    %88 = vector.broadcast %cst_36 : f32 to vector<8x1xf32>
    %89 = arith.addf %85, %88 : vector<8x1xf32>
    %90 = math.rsqrt %89 : vector<8x1xf32>
    %91 = vector.broadcast %90 : vector<8x1xf32> to vector<8x32xf32>
    %92 = arith.mulf %87, %91 : vector<8x32xf32>
    %93 = vector.broadcast %73 : vector<1x32xf32> to vector<8x32xf32>
    %94 = arith.mulf %92, %93 : vector<8x32xf32>
    %95 = vector.broadcast %74 : vector<1x32xf32> to vector<8x32xf32>
    %96 = arith.addf %94, %95 : vector<8x32xf32>
    %97 = arith.truncf %96 : vector<8x32xf32> to vector<8x32xbf16>
    %c0_37 = arith.constant 0 : index
    %c0_38 = arith.constant 0 : index
    %98 = vector.load %arg10[%c0_37, %c0_38] : memref<32x128xbf16, #tpu.memory_space<vmem>>, vector<32x128xbf16>
    %cst_39 = arith.constant dense<0.000000e+00> : vector<8x128xf32>
    %99 = tpu.matmul %97, %98, %cst_39 {dimension_numbers = #tpu.dot_dimension_numbers<[1], [0], [0], [1], [0, 0, 1, 1], [], []>} : vector<8x32xbf16>, vector<32x128xbf16>, vector<8x128xf32> -> vector<8x128xf32>
    %c0_40 = arith.constant 0 : index
    %c0_41 = arith.constant 0 : index
    %100 = vector.load %arg11[%c0_40, %c0_41] : memref<1x128xf32, #tpu.memory_space<vmem>>, vector<1x128xf32>
    %101 = vector.broadcast %100 : vector<1x128xf32> to vector<8x128xf32>
    %102 = arith.addf %99, %101 : vector<8x128xf32>
    %103 = arith.negf %102 : vector<8x128xf32>
    %104 = math.exp %103 : vector<8x128xf32>
    %cst_42 = arith.constant 1.000000e+00 : f32
    %105 = vector.broadcast %cst_42 : f32 to vector<8x128xf32>
    %106 = arith.addf %105, %104 : vector<8x128xf32>
    %107 = arith.divf %105, %106 : vector<8x128xf32>
    %108 = arith.mulf %102, %107 : vector<8x128xf32>
    %109 = arith.truncf %108 : vector<8x128xf32> to vector<8x128xbf16>
    %c0_43 = arith.constant 0 : index
    %c0_44 = arith.constant 0 : index
    %110 = vector.load %arg12[%c0_43, %c0_44] : memref<128x32xbf16, #tpu.memory_space<vmem>>, vector<128x32xbf16>
    %cst_45 = arith.constant dense<0.000000e+00> : vector<8x32xf32>
    %111 = tpu.matmul %109, %110, %cst_45 {dimension_numbers = #tpu.dot_dimension_numbers<[1], [0], [0], [1], [0, 0, 1, 1], [], []>} : vector<8x128xbf16>, vector<128x32xbf16>, vector<8x32xf32> -> vector<8x32xf32>
    %c0_46 = arith.constant 0 : index
    %c0_47 = arith.constant 0 : index
    %112 = vector.load %arg13[%c0_46, %c0_47] : memref<1x32xf32, #tpu.memory_space<vmem>>, vector<1x32xf32>
    %113 = vector.broadcast %112 : vector<1x32xf32> to vector<8x32xf32>
    %114 = arith.addf %111, %113 : vector<8x32xf32>
    %115 = arith.addf %72, %114 : vector<8x32xf32>
    %c0_48 = arith.constant 0 : index
    %c0_49 = arith.constant 0 : index
    %c0_50 = arith.constant 0 : index
    %116 = vector.load %arg14[%c0_48, %c0_49, %c0_50] : memref<1x8x32xf32, #tpu.memory_space<vmem>>, vector<1x8x32xf32>
    %117 = vector.shape_cast %116 : vector<1x8x32xf32> to vector<8x32xf32>
    %118 = vector.shape_cast %115 : vector<8x32xf32> to vector<1x8x32xf32>
    tpu.vector_store %arg14[%c0_48, %c0_49, %c0_50], %118 {strides = array<i32>} : memref<1x8x32xf32, #tpu.memory_space<vmem>>, vector<1x8x32xf32>,
    return
  }
  func.func @transform_0(%arg0: i32) -> (i32, i32, i32) {
    %c0_i32 = arith.constant 0 : i32
    %c0_i32_0 = arith.constant 0 : i32
    %c0_i32_1 = arith.constant 0 : i32
    return %arg0, %c0_i32, %c0_i32_0 : i32, i32, i32
  }
  func.func @transform_1(%arg0: i32) -> (i32, i32) {
    %c0_i32 = arith.constant 0 : i32
    %c0_i32_0 = arith.constant 0 : i32
    %c0_i32_1 = arith.constant 0 : i32
    return %c0_i32, %c0_i32_0 : i32, i32
  }
  func.func @transform_2(%arg0: i32) -> (i32, i32) {
    %c0_i32 = arith.constant 0 : i32
    %c0_i32_0 = arith.constant 0 : i32
    %c0_i32_1 = arith.constant 0 : i32
    return %c0_i32, %c0_i32_0 : i32, i32
  }
  func.func @transform_3(%arg0: i32) -> (i32, i32) {
    %c0_i32 = arith.constant 0 : i32
    %c0_i32_0 = arith.constant 0 : i32
    %c0_i32_1 = arith.constant 0 : i32
    return %c0_i32, %c0_i32_0 : i32, i32
  }
  func.func @transform_4(%arg0: i32) -> (i32, i32) {
    %c0_i32 = arith.constant 0 : i32
    %c0_i32_0 = arith.constant 0 : i32
    %c0_i32_1 = arith.constant 0 : i32
    return %c0_i32, %c0_i32_0 : i32, i32
  }
  func.func @transform_5(%arg0: i32) -> (i32, i32) {
    %c0_i32 = arith.constant 0 : i32
    %c0_i32_0 = arith.constant 0 : i32
    %c0_i32_1 = arith.constant 0 : i32
    return %c0_i32, %c0_i32_0 : i32, i32
  }
  func.func @transform_6(%arg0: i32) -> (i32, i32) {
    %c0_i32 = arith.constant 0 : i32
    %c0_i32_0 = arith.constant 0 : i32
    %c0_i32_1 = arith.constant 0 : i32
    return %c0_i32, %c0_i32_0 : i32, i32
  }
  func.func @transform_7(%arg0: i32) -> (i32, i32) {
    %c0_i32 = arith.constant 0 : i32
    %c0_i32_0 = arith.constant 0 : i32
    %c0_i32_1 = arith.constant 0 : i32
    return %c0_i32, %c0_i32_0 : i32, i32
  }
  func.func @transform_8(%arg0: i32) -> (i32, i32) {
    %c0_i32 = arith.constant 0 : i32
    %c0_i32_0 = arith.constant 0 : i32
    %c0_i32_1 = arith.constant 0 : i32
    return %c0_i32, %c0_i32_0 : i32, i32
  }
  func.func @transform_9(%arg0: i32) -> (i32, i32) {
    %c0_i32 = arith.constant 0 : i32
    %c0_i32_0 = arith.constant 0 : i32
    %c0_i32_1 = arith.constant 0 : i32
    return %c0_i32, %c0_i32_0 : i32, i32
  }
  func.func @transform_10(%arg0: i32) -> (i32, i32) {
    %c0_i32 = arith.constant 0 : i32
    %c0_i32_0 = arith.constant 0 : i32
    %c0_i32_1 = arith.constant 0 : i32
    return %c0_i32, %c0_i32_0 : i32, i32
  }
  func.func @transform_11(%arg0: i32) -> (i32, i32) {
    %c0_i32 = arith.constant 0 : i32
    %c0_i32_0 = arith.constant 0 : i32
    %c0_i32_1 = arith.constant 0 : i32
    return %c0_i32, %c0_i32_0 : i32, i32
  }
  func.func @transform_12(%arg0: i32) -> (i32, i32) {
    %c0_i32 = arith.constant 0 : i32
    %c0_i32_0 = arith.constant 0 : i32
    %c0_i32_1 = arith.constant 0 : i32
    return %c0_i32, %c0_i32_0 : i32, i32
  }
  func.func @transform_13(%arg0: i32) -> (i32, i32, i32) {
    %c0_i32 = arith.constant 0 : i32
    %c0_i32_0 = arith.constant 0 : i32
    %c0_i32_1 = arith.constant 0 : i32
    return %arg0, %c0_i32, %c0_i32_0 : i32, i32, i32
  }
}

module attributes {stable_mosaic.version = 11 : i64} {
  func.func @transformer_block_kernel(%arg0: i32, %arg1: memref<1x8x32xf32, #tpu.memory_space<vmem>>, %arg2: memref<1x32xf32, #tpu.memory_space<vmem>>, %arg3: memref<1x32xf32, #tpu.memory_space<vmem>>, %arg4: memref<32x128xbf16, #tpu.memory_space<vmem>>, %arg5: memref<1x128xf32, #tpu.memory_space<vmem>>, %arg6: memref<64x32xbf16, #tpu.memory_space<vmem>>, %arg7: memref<1x32xf32, #tpu.memory_space<vmem>>, %arg8: memref<1x32xf32, #tpu.memory_space<vmem>>, %arg9: memref<1x32xf32, #tpu.memory_space<vmem>>, %arg10: memref<32x128xbf16, #tpu.memory_space<vmem>>, %arg11: memref<1x128xf32, #tpu.memory_space<vmem>>, %arg12: memref<128x32xbf16, #tpu.memory_space<vmem>>, %arg13: memref<1x32xf32, #tpu.memory_space<vmem>>, %arg14: memref<1x8x32xf32, #tpu.memory_space<vmem>>) attributes {dimension_semantics = [#tpu.dimension_semantics<parallel>], iteration_bounds = array<i64: 2>, scalar_prefetch = 0 : i64, scratch_operands = 0 : i64, tpu.core_type = #tpu.core_type<tc>, window_params = [{transform_indices = @transform_0, window_bounds = array<i64: 1, 8, 32>}, {pipeline_mode = #tpu.pipeline_mode<synchronous>, transform_indices = @transform_1, window_bounds = array<i64: 1, 32>}, {pipeline_mode = #tpu.pipeline_mode<synchronous>, transform_indices = @transform_2, window_bounds = array<i64: 1, 32>}, {pipeline_mode = #tpu.pipeline_mode<synchronous>, transform_indices = @transform_3, window_bounds = array<i64: 32, 128>}, {pipeline_mode = #tpu.pipeline_mode<synchronous>, transform_indices = @transform_4, window_bounds = array<i64: 1, 128>}, {pipeline_mode = #tpu.pipeline_mode<synchronous>, transform_indices = @transform_5, window_bounds = array<i64: 64, 32>}, {pipeline_mode = #tpu.pipeline_mode<synchronous>, transform_indices = @transform_6, window_bounds = array<i64: 1, 32>}, {pipeline_mode = #tpu.pipeline_mode<synchronous>, transform_indices = @transform_7, window_bounds = array<i64: 1, 32>}, {pipeline_mode = #tpu.pipeline_mode<synchronous>, transform_indices = @transform_8, window_bounds = array<i64: 1, 32>}, {pipeline_mode = #tpu.pipeline_mode<synchronous>, transform_indices = @transform_9, window_bounds = array<i64: 32, 128>}, {pipeline_mode = #tpu.pipeline_mode<synchronous>, transform_indices = @transform_10, window_bounds = array<i64: 1, 128>}, {pipeline_mode = #tpu.pipeline_mode<synchronous>, transform_indices = @transform_11, window_bounds = array<i64: 128, 32>}, {pipeline_mode = #tpu.pipeline_mode<synchronous>, transform_indices = @transform_12, window_bounds = array<i64: 1, 32>}, {transform_indices = @transform_13, window_bounds = array<i64: 1, 8, 32>}]} {
    %c0 = arith.constant 0 : index
    %c0_0 = arith.constant 0 : index
    %c0_1 = arith.constant 0 : index
    %0 = vector.load %arg1[%c0, %c0_0, %c0_1] : memref<1x8x32xf32, #tpu.memory_space<vmem>>, vector<1x8x32xf32>
    %1 = vector.shape_cast %0 : vector<1x8x32xf32> to vector<8x32xf32>
    %c0_2 = arith.constant 0 : index
    %c0_3 = arith.constant 0 : index
    %2 = vector.load %arg2[%c0_2, %c0_3] : memref<1x32xf32, #tpu.memory_space<vmem>>, vector<1x32xf32>
    %c0_4 = arith.constant 0 : index
    %c0_5 = arith.constant 0 : index
    %3 = vector.load %arg3[%c0_4, %c0_5] : memref<1x32xf32, #tpu.memory_space<vmem>>, vector<1x32xf32>
    %cst = arith.constant dense<0.000000e+00> : vector<8xf32>
    %4 = vector.multi_reduction <add>, %1, %cst [1] : vector<8x32xf32> to vector<8xf32>
    %5 = vector.shape_cast %4 : vector<8xf32> to vector<8x1xf32>
    %cst_6 = arith.constant 3.200000e+01 : f32
    %6 = vector.broadcast %cst_6 : f32 to vector<8x1xf32>
    %7 = arith.divf %5, %6 : vector<8x1xf32>
    %8 = vector.broadcast %7 : vector<8x1xf32> to vector<8x32xf32>
    %9 = arith.subf %1, %8 : vector<8x32xf32>
    %10 = arith.mulf %9, %9 : vector<8x32xf32>
    %cst_7 = arith.constant dense<0.000000e+00> : vector<8xf32>
    %11 = vector.multi_reduction <add>, %10, %cst_7 [1] : vector<8x32xf32> to vector<8xf32>
    %12 = vector.shape_cast %11 : vector<8xf32> to vector<8x1xf32>
    %cst_8 = arith.constant 3.200000e+01 : f32
    %13 = vector.broadcast %cst_8 : f32 to vector<8x1xf32>
    %14 = arith.divf %12, %13 : vector<8x1xf32>
    %15 = vector.broadcast %7 : vector<8x1xf32> to vector<8x32xf32>
    %16 = arith.subf %1, %15 : vector<8x32xf32>
    %cst_9 = arith.constant 9.99999974E-6 : f32
    %17 = vector.broadcast %cst_9 : f32 to vector<8x1xf32>
    %18 = arith.addf %14, %17 : vector<8x1xf32>
    %19 = math.rsqrt %18 : vector<8x1xf32>
    %20 = vector.broadcast %19 : vector<8x1xf32> to vector<8x32xf32>
    %21 = arith.mulf %16, %20 : vector<8x32xf32>
    %22 = vector.broadcast %2 : vector<1x32xf32> to vector<8x32xf32>
    %23 = arith.mulf %21, %22 : vector<8x32xf32>
    %24 = vector.broadcast %3 : vector<1x32xf32> to vector<8x32xf32>
    %25 = arith.addf %23, %24 : vector<8x32xf32>
    %26 = arith.truncf %25 : vector<8x32xf32> to vector<8x32xbf16>
    %c0_10 = arith.constant 0 : index
    %c0_11 = arith.constant 0 : index
    %27 = vector.load %arg4[%c0_10, %c0_11] : memref<32x128xbf16, #tpu.memory_space<vmem>>, vector<32x128xbf16>
    %cst_12 = arith.constant dense<0.000000e+00> : vector<8x128xf32>
    %28 = tpu.matmul %26, %27, %cst_12 {dimension_numbers = #tpu.dot_dimension_numbers<[1], [0], [0], [1], [0, 0, 1, 1], [], []>} : vector<8x32xbf16>, vector<32x128xbf16>, vector<8x128xf32> -> vector<8x128xf32>
    %c0_13 = arith.constant 0 : index
    %c0_14 = arith.constant 0 : index
    %29 = vector.load %arg5[%c0_13, %c0_14] : memref<1x128xf32, #tpu.memory_space<vmem>>, vector<1x128xf32>
    %30 = vector.broadcast %29 : vector<1x128xf32> to vector<8x128xf32>
    %31 = arith.addf %28, %30 : vector<8x128xf32>
    %32 = arith.truncf %31 : vector<8x128xf32> to vector<8x128xbf16>
    %33 = vector.extract_strided_slice %32 {offsets = [0, 0], sizes = [8, 16], strides = [1, 1]} : vector<8x128xbf16> to vector<8x16xbf16>
    %34 = vector.extract_strided_slice %32 {offsets = [0, 32], sizes = [8, 16], strides = [1, 1]} : vector<8x128xbf16> to vector<8x16xbf16>
    %35 = vector.extract_strided_slice %32 {offsets = [0, 64], sizes = [8, 32], strides = [1, 1]} : vector<8x128xbf16> to vector<8x32xbf16>
    "tpu.trace_start"() <{level = 10 : i32, message = "qd,kd->qk"}> : () -> ()
    %cst_15 = arith.constant dense<0.000000e+00> : vector<8x8xf32>
    %36 = tpu.matmul %33, %34, %cst_15 {dimension_numbers = #tpu.dot_dimension_numbers<[1], [1], [0], [0], [0, 0, 1, 0], [], []>} : vector<8x16xbf16>, vector<8x16xbf16>, vector<8x8xf32> -> vector<8x8xf32>
    "tpu.trace_stop"() : () -> ()
    %cst_16 = arith.constant dense<0xFF800000> : vector<8xf32>
    %37 = vector.multi_reduction <maximumf>, %36, %cst_16 [1] : vector<8x8xf32> to vector<8xf32>
    %38 = vector.shape_cast %37 : vector<8xf32> to vector<8x1xf32>
    %39 = vector.broadcast %38 : vector<8x1xf32> to vector<8x8xf32>
    %40 = arith.subf %36, %39 : vector<8x8xf32>
    %41 = math.exp %40 : vector<8x8xf32>
    %cst_17 = arith.constant dense<0.000000e+00> : vector<8xf32>
    %42 = vector.multi_reduction <add>, %41, %cst_17 [1] : vector<8x8xf32> to vector<8xf32>
    %43 = vector.shape_cast %42 : vector<8xf32> to vector<8x1xf32>
    %44 = tpu.reciprocal %43 {approx = true} : vector<8x1xf32> -> vector<8x1xf32>
    %45 = vector.broadcast %44 : vector<8x1xf32> to vector<8x8xf32>
    %46 = arith.mulf %41, %45 : vector<8x8xf32>
    %47 = arith.truncf %46 : vector<8x8xf32> to vector<8x8xbf16>
    %cst_18 = arith.constant dense<0.000000e+00> : vector<8x32xf32>
    %48 = tpu.matmul %47, %35, %cst_18 {dimension_numbers = #tpu.dot_dimension_numbers<[1], [0], [0], [1], [0, 0, 1, 1], [], []>} : vector<8x8xbf16>, vector<8x32xbf16>, vector<8x32xf32> -> vector<8x32xf32>
    %49 = vector.extract_strided_slice %32 {offsets = [0, 16], sizes = [8, 16], strides = [1, 1]} : vector<8x128xbf16> to vector<8x16xbf16>
    %50 = vector.extract_strided_slice %32 {offsets = [0, 48], sizes = [8, 16], strides = [1, 1]} : vector<8x128xbf16> to vector<8x16xbf16>
    %51 = vector.extract_strided_slice %32 {offsets = [0, 96], sizes = [8, 32], strides = [1, 1]} : vector<8x128xbf16> to vector<8x32xbf16>
    "tpu.trace_start"() <{level = 10 : i32, message = "qd,kd->qk"}> : () -> ()
    %cst_19 = arith.constant dense<0.000000e+00> : vector<8x8xf32>
    %52 = tpu.matmul %49, %50, %cst_19 {dimension_numbers = #tpu.dot_dimension_numbers<[1], [1], [0], [0], [0, 0, 1, 0], [], []>} : vector<8x16xbf16>, vector<8x16xbf16>, vector<8x8xf32> -> vector<8x8xf32>
    "tpu.trace_stop"() : () -> ()
    %cst_20 = arith.constant dense<0xFF800000> : vector<8xf32>
    %53 = vector.multi_reduction <maximumf>, %52, %cst_20 [1] : vector<8x8xf32> to vector<8xf32>
    %54 = vector.shape_cast %53 : vector<8xf32> to vector<8x1xf32>
    %55 = vector.broadcast %54 : vector<8x1xf32> to vector<8x8xf32>
    %56 = arith.subf %52, %55 : vector<8x8xf32>
    %57 = math.exp %56 : vector<8x8xf32>
    %cst_21 = arith.constant dense<0.000000e+00> : vector<8xf32>
    %58 = vector.multi_reduction <add>, %57, %cst_21 [1] : vector<8x8xf32> to vector<8xf32>
    %59 = vector.shape_cast %58 : vector<8xf32> to vector<8x1xf32>
    %60 = tpu.reciprocal %59 {approx = true} : vector<8x1xf32> -> vector<8x1xf32>
    %61 = vector.broadcast %60 : vector<8x1xf32> to vector<8x8xf32>
    %62 = arith.mulf %57, %61 : vector<8x8xf32>
    %63 = arith.truncf %62 : vector<8x8xf32> to vector<8x8xbf16>
    %cst_22 = arith.constant dense<0.000000e+00> : vector<8x32xf32>
    %64 = tpu.matmul %63, %51, %cst_22 {dimension_numbers = #tpu.dot_dimension_numbers<[1], [0], [0], [1], [0, 0, 1, 1], [], []>} : vector<8x8xbf16>, vector<8x32xbf16>, vector<8x32xf32> -> vector<8x32xf32>
    %65 = tpu.concatenate %48, %64 in 1 : vector<8x32xf32>, vector<8x32xf32> -> vector<8x64xf32>
    %66 = arith.truncf %65 : vector<8x64xf32> to vector<8x64xbf16>
    %c0_23 = arith.constant 0 : index
    %c0_24 = arith.constant 0 : index
    %67 = vector.load %arg6[%c0_23, %c0_24] : memref<64x32xbf16, #tpu.memory_space<vmem>>, vector<64x32xbf16>
    %cst_25 = arith.constant dense<0.000000e+00> : vector<8x32xf32>
    %68 = tpu.matmul %66, %67, %cst_25 {dimension_numbers = #tpu.dot_dimension_numbers<[1], [0], [0], [1], [0, 0, 1, 1], [], []>} : vector<8x64xbf16>, vector<64x32xbf16>, vector<8x32xf32> -> vector<8x32xf32>
    %c0_26 = arith.constant 0 : index
    %c0_27 = arith.constant 0 : index
    %69 = vector.load %arg7[%c0_26, %c0_27] : memref<1x32xf32, #tpu.memory_space<vmem>>, vector<1x32xf32>
    %70 = vector.broadcast %69 : vector<1x32xf32> to vector<8x32xf32>
    %71 = arith.addf %68, %70 : vector<8x32xf32>
    %72 = arith.addf %1, %71 : vector<8x32xf32>
    %c0_28 = arith.constant 0 : index
    %c0_29 = arith.constant 0 : index
    %73 = vector.load %arg8[%c0_28, %c0_29] : memref<1x32xf32, #tpu.memory_space<vmem>>, vector<1x32xf32>
    %c0_30 = arith.constant 0 : index
    %c0_31 = arith.constant 0 : index
    %74 = vector.load %arg9[%c0_30, %c0_31] : memref<1x32xf32, #tpu.memory_space<vmem>>, vector<1x32xf32>
    %cst_32 = arith.constant dense<0.000000e+00> : vector<8xf32>
    %75 = vector.multi_reduction <add>, %72, %cst_32 [1] : vector<8x32xf32> to vector<8xf32>
    %76 = vector.shape_cast %75 : vector<8xf32> to vector<8x1xf32>
    %cst_33 = arith.constant 3.200000e+01 : f32
    %77 = vector.broadcast %cst_33 : f32 to vector<8x1xf32>
    %78 = arith.divf %76, %77 : vector<8x1xf32>
    %79 = vector.broadcast %78 : vector<8x1xf32> to vector<8x32xf32>
    %80 = arith.subf %72, %79 : vector<8x32xf32>
    %81 = arith.mulf %80, %80 : vector<8x32xf32>
    %cst_34 = arith.constant dense<0.000000e+00> : vector<8xf32>
    %82 = vector.multi_reduction <add>, %81, %cst_34 [1] : vector<8x32xf32> to vector<8xf32>
    %83 = vector.shape_cast %82 : vector<8xf32> to vector<8x1xf32>
    %cst_35 = arith.constant 3.200000e+01 : f32
    %84 = vector.broadcast %cst_35 : f32 to vector<8x1xf32>
    %85 = arith.divf %83, %84 : vector<8x1xf32>
    %86 = vector.broadcast %78 : vector<8x1xf32> to vector<8x32xf32>
    %87 = arith.subf %72, %86 : vector<8x32xf32>
    %cst_36 = arith.constant 9.99999974E-6 : f32
    %88 = vector.broadcast %cst_36 : f32 to vector<8x1xf32>
    %89 = arith.addf %85, %88 : vector<8x1xf32>
    %90 = math.rsqrt %89 : vector<8x1xf32>
    %91 = vector.broadcast %90 : vector<8x1xf32> to vector<8x32xf32>
    %92 = arith.mulf %87, %91 : vector<8x32xf32>
    %93 = vector.broadcast %73 : vector<1x32xf32> to vector<8x32xf32>
    %94 = arith.mulf %92, %93 : vector<8x32xf32>
    %95 = vector.broadcast %74 : vector<1x32xf32> to vector<8x32xf32>
    %96 = arith.addf %94, %95 : vector<8x32xf32>
    %97 = arith.truncf %96 : vector<8x32xf32> to vector<8x32xbf16>
    %c0_37 = arith.constant 0 : index
    %c0_38 = arith.constant 0 : index
    %98 = vector.load %arg10[%c0_37, %c0_38] : memref<32x128xbf16, #tpu.memory_space<vmem>>, vector<32x128xbf16>
    %cst_39 = arith.constant dense<0.000000e+00> : vector<8x128xf32>
    %99 = tpu.matmul %97, %98, %cst_39 {dimension_numbers = #tpu.dot_dimension_numbers<[1], [0], [0], [1], [0, 0, 1, 1], [], []>} : vector<8x32xbf16>, vector<32x128xbf16>, vector<8x128xf32> -> vector<8x128xf32>
    %c0_40 = arith.constant 0 : index
    %c0_41 = arith.constant 0 : index
    %100 = vector.load %arg11[%c0_40, %c0_41] : memref<1x128xf32, #tpu.memory_space<vmem>>, vector<1x128xf32>
    %101 = vector.broadcast %100 : vector<1x128xf32> to vector<8x128xf32>
    %102 = arith.addf %99, %101 : vector<8x128xf32>
    %103 = arith.negf %102 : vector<8x128xf32>
    %104 = math.exp %103 : vector<8x128xf32>
    %cst_42 = arith.constant 1.000000e+00 : f32
    %105 = vector.broadcast %cst_42 : f32 to vector<8x128xf32>
    %106 = arith.addf %105, %104 : vector<8x128xf32>
    %107 = arith.divf %105, %106 : vector<8x128xf32>
    %108 = arith.mulf %102, %107 : vector<8x128xf32>
    %109 = arith.truncf %108 : vector<8x128xf32> to vector<8x128xbf16>
    %c0_43 = arith.constant 0 : index
    %c0_44 = arith.constant 0 : index
    %110 = vector.load %arg12[%c0_43, %c0_44] : memref<128x32xbf16, #tpu.memory_space<vmem>>, vector<128x32xbf16>
    %cst_45 = arith.constant dense<0.000000e+00> : vector<8x32xf32>
    %111 = tpu.matmul %109, %110, %cst_45 {dimension_numbers = #tpu.dot_dimension_numbers<[1], [0], [0], [1], [0, 0, 1, 1], [], []>} : vector<8x128xbf16>, vector<128x32xbf16>, vector<8x32xf32> -> vector<8x32xf32>
    %c0_46 = arith.constant 0 : index
    %c0_47 = arith.constant 0 : index
    %112 = vector.load %arg13[%c0_46, %c0_47] : memref<1x32xf32, #tpu.memory_space<vmem>>, vector<1x32xf32>
    %113 = vector.broadcast %112 : vector<1x32xf32> to vector<8x32xf32>
    %114 = arith.addf %111, %113 : vector<8x32xf32>
    %115 = arith.addf %72, %114 : vector<8x32xf32>
    %c0_48 = arith.constant 0 : index
    %c0_49 = arith.constant 0 : index
    %c0_50 = arith.constant 0 : index
    %116 = vector.load %arg14[%c0_48, %c0_49, %c0_50] : memref<1x8x32xf32, #tpu.memory_space<vmem>>, vector<1x8x32xf32>
    %117 = vector.shape_cast %116 : vector<1x8x32xf32> to vector<8x32xf32>
    %118 = vector.shape_cast %115 : vector<8x32xf32> to vector<1x8x32xf32>
    tpu.vector_store %arg14[%c0_48, %c0_49, %c0_50], %118 {strides = array<i32>} : memref<1x8x32xf32, #tpu.memory_space<vmem>>, vector<1x8x32xf32>,
    return
  }
  func.func @transform_0(%arg0: i32) -> (i32, i32, i32) {
    %c0_i32 = arith.constant 0 : i32
    %c0_i32_0 = arith.constant 0 : i32
    %c0_i32_1 = arith.constant 0 : i32
    return %arg0, %c0_i32, %c0_i32_0 : i32, i32, i32
  }
  func.func @transform_1(%arg0: i32) -> (i32, i32) {
    %c0_i32 = arith.constant 0 : i32
    %c0_i32_0 = arith.constant 0 : i32
    %c0_i32_1 = arith.constant 0 : i32
    return %c0_i32, %c0_i32_0 : i32, i32
  }
  func.func @transform_2(%arg0: i32) -> (i32, i32) {
    %c0_i32 = arith.constant 0 : i32
    %c0_i32_0 = arith.constant 0 : i32
    %c0_i32_1 = arith.constant 0 : i32
    return %c0_i32, %c0_i32_0 : i32, i32
  }
  func.func @transform_3(%arg0: i32) -> (i32, i32) {
    %c0_i32 = arith.constant 0 : i32
    %c0_i32_0 = arith.constant 0 : i32
    %c0_i32_1 = arith.constant 0 : i32
    return %c0_i32, %c0_i32_0 : i32, i32
  }
  func.func @transform_4(%arg0: i32) -> (i32, i32) {
    %c0_i32 = arith.constant 0 : i32
    %c0_i32_0 = arith.constant 0 : i32
    %c0_i32_1 = arith.constant 0 : i32
    return %c0_i32, %c0_i32_0 : i32, i32
  }
  func.func @transform_5(%arg0: i32) -> (i32, i32) {
    %c0_i32 = arith.constant 0 : i32
    %c0_i32_0 = arith.constant 0 : i32
    %c0_i32_1 = arith.constant 0 : i32
    return %c0_i32, %c0_i32_0 : i32, i32
  }
  func.func @transform_6(%arg0: i32) -> (i32, i32) {
    %c0_i32 = arith.constant 0 : i32
    %c0_i32_0 = arith.constant 0 : i32
    %c0_i32_1 = arith.constant 0 : i32
    return %c0_i32, %c0_i32_0 : i32, i32
  }
  func.func @transform_7(%arg0: i32) -> (i32, i32) {
    %c0_i32 = arith.constant 0 : i32
    %c0_i32_0 = arith.constant 0 : i32
    %c0_i32_1 = arith.constant 0 : i32
    return %c0_i32, %c0_i32_0 : i32, i32
  }
  func.func @transform_8(%arg0: i32) -> (i32, i32) {
    %c0_i32 = arith.constant 0 : i32
    %c0_i32_0 = arith.constant 0 : i32
    %c0_i32_1 = arith.constant 0 : i32
    return %c0_i32, %c0_i32_0 : i32, i32
  }
  func.func @transform_9(%arg0: i32) -> (i32, i32) {
    %c0_i32 = arith.constant 0 : i32
    %c0_i32_0 = arith.constant 0 : i32
    %c0_i32_1 = arith.constant 0 : i32
    return %c0_i32, %c0_i32_0 : i32, i32
  }
  func.func @transform_10(%arg0: i32) -> (i32, i32) {
    %c0_i32 = arith.constant 0 : i32
    %c0_i32_0 = arith.constant 0 : i32
    %c0_i32_1 = arith.constant 0 : i32
    return %c0_i32, %c0_i32_0 : i32, i32
  }
  func.func @transform_11(%arg0: i32) -> (i32, i32) {
    %c0_i32 = arith.constant 0 : i32
    %c0_i32_0 = arith.constant 0 : i32
    %c0_i32_1 = arith.constant 0 : i32
    return %c0_i32, %c0_i32_0 : i32, i32
  }
  func.func @transform_12(%arg0: i32) -> (i32, i32) {
    %c0_i32 = arith.constant 0 : i32
    %c0_i32_0 = arith.constant 0 : i32
    %c0_i32_1 = arith.constant 0 : i32
    return %c0_i32, %c0_i32_0 : i32, i32
  }
  func.func @transform_13(%arg0: i32) -> (i32, i32, i32) {
    %c0_i32 = arith.constant 0 : i32
    %c0_i32_0 = arith.constant 0 : i32
    %c0_i32_1 = arith.constant 0 : i32
    return %arg0, %c0_i32, %c0_i32_0 : i32, i32, i32
  }
}

</mosaic_0001>

<bundles_post_ra>
// kernel: tpu_custom_call.1
= control target key start
LH: loop header
LB: loop body
LE: loop exit
PB: predicated region body
PF: predicated region fallthrough
CT: control target
= control target key end

     0   :  { %s1741_s0 = inlined_call_operand.vmem [shape: f32[2,8,32], index: 0, kind: input, shape index: {}]   ;;  %s1742_s1 = inlined_call_operand.vmem [shape: f32[1,32], index: 1, kind: input, shape index: {}]   ;;  %s1743_s2 = inlined_call_operand.vmem [shape: f32[1,32], index: 2, kind: input, shape index: {}]   ;;  %s1744_s3 = inlined_call_operand.vmem [shape: bf16[32,128], index: 3, kind: input, shape index: {}]   ;;  %s1745_s4 = inlined_call_operand.vmem [shape: f32[1,128], index: 4, kind: input, shape index: {}]   ;;  %s1746_s5 = inlined_call_operand.vmem [shape: bf16[64,32], index: 5, kind: input, shape index: {}]   ;;  %s1747_s6 = inlined_call_operand.vmem [shape: f32[1,32], index: 6, kind: input, shape index: {}]   ;;  %s1748_s7 = inlined_call_operand.vmem [shape: f32[1,32], index: 7, kind: input, shape index: {}]   ;;  %s1749_s8 = inlined_call_operand.vmem [shape: f32[1,32], index: 8, kind: input, shape index: {}]   ;;  %s1750_s9 = inlined_call_operand.vmem [shape: bf16[32,128], index: 9, kind: input, shape index: {}]   ;;  %s1751_s10 = inlined_call_operand.vmem [shape: f32[1,128], index: 10, kind: input, shape index: {}]   ;;  %s1752_s11 = inlined_call_operand.vmem [shape: bf16[128,32], index: 11, kind: input, shape index: {}]   ;;  %s1753_s12 = inlined_call_operand.vmem [shape: f32[1,32], index: 12, kind: input, shape index: {}]   ;;  %s1754_s13 = inlined_call_operand.hbm [shape: f32[2,8,32], index: 13, kind: output, shape index: {}]  }
   0x1   :  { %1755 = sst [smem:[#allocation5_spill]] %s1741_s0 }
   0x2   :  { %1756 = sst [smem:[#allocation6_spill]] %s1742_s1 }
   0x3   :  { %1757 = sst [smem:[#allocation7_spill]] %s1743_s2 }
   0x4   :  { %18 = vsyncpa [#allocation3], 0 }
   0x5   :  { %20 = vsyncpa [#allocation3 + $0x1], 0  ;;  %s1501_s25 = smov 0   ;;  %s1503_s26 = smov 0  }
   0x6   :  { %s1505_s27 = smov 0   ;;  %s1507_s28 = smov 0  }
   0x7 LB: > { %s1522_s29 = sadd.s32 4294967295, %s1421_s28   ;;  %s1139_s30 = sadd.s32 4294967294, %s1421_s28   ;;  %s1421_s28 = sphi %s1507_s28, %s1766_s28   ;;  %s1417_s27 = sphi %s1505_s27, %s1765_s27   ;;  %s1413_s26 = sphi %s1503_s26, %s1764_s26   ;;  %s1409_s25 = sphi %s1501_s25, %s1763_s25  }
   0x8   : > { %s1526_s14 = sadd.s32 1, %s1421_s28   ;;  %s311_s15 = sadd.s32 1, %s1417_s27 }
   0x9   : > { %s308_s16 = ssub.s32 %s1421_s28, %s1526_s14  ;;  %p321_p0 = scmp.ne.s32.totalorder %s1417_s27, %s1413_s26 }
   0xa   : > { %p309_p1 = scmp.eq.s32.totalorder %s308_s16, 0  ;;  %p322_p2 = scmp.eq.s32.totalorder %s1522_s29, 1 }
   0xb   : > { %p327_p3 = scmp.ne.s32.totalorder %s1413_s26, %s1409_s25  ;;  %p328_p4 = scmp.eq.s32.totalorder %s1139_s30, 1 }
   0xc   : > { %s1537_s17 = scalar_select %p309_p1, %s1417_s27, %s311_s15  }
   0xd   : > { %p1539_p5 = por %p322_p2, %p321_p0  ;;  %p1543_p6 = por %p328_p4, %p327_p3 }
   0xe   : > { %p1142_p7 = scmp.ge.s32.totalorder %s1421_s28, 1  ;;  %p389_p8 = scmp.lt.s32.totalorder %s1421_s28, 3 }
  0x10   : > { %p390_p9 = pnand %p1142_p7, %p389_p8 }
  0x11   : > { %p432_p10 = scmp.lt.s32.totalorder (!%p390_p9), %s1522_s29, 1  ;;  %vm440_vm0 = vcmask (!%p390_p9), 261120   ;;  %s1760_s0 = sld [smem:[#allocation5_spill]] (!%p390_p9)  ;;  %v1327_v7 = vld [vmem:[%s1744_s3] sm:$0xff] (!%p390_p9)   ;;  %v1423_v8 = vmov (!%p390_p9), 0.0   ;;  %vm1424_vm1 = vmmov (!%p390_p9), 0  }
  0x12   : > { %393 = sbr.rel (%p390_p9) target bundleno = 3083 (0xc0b), region = 72  ;;  %1209 = vmatprep.subr.bf16.mxu1 (!%p390_p9), %v1423_v8  ;;  %1213 = vmatprep.mubr.msk.bf16.mxu1 (!%p390_p9), %vm1424_vm1, %v1423_v8  ;;  %v1328_v9 = vld [vmem:[%s1744_s3 + $0x8] sm:$0xff] (!%p390_p9)   ;;  %s1761_s1 = sld [smem:[#allocation6_spill]] (!%p390_p9)  ;;  %v1147_v20 = vld [vmem:[%s1745_s4] ss:$0 sm:$0xff] (!%p390_p9)  ;;  %vm540_vm2 = vcmask (!%p390_p9), 130048  }
  0x13   : > { %1210 = vmatpush3.bf16.msra.mxu1 (!%p390_p9), %v1327_v7  ;;  %1235 = vmatprep.subr.bf16.mxu0 (!%p390_p9), %v1423_v8  ;;  %s1762_s2 = sld [smem:[#allocation7_spill]] (!%p390_p9)  ;;  %s1425_s16 = smov (!%p390_p9), 64   ;;  %vm605_vm3 = vcmask (!%p390_p9), 1043456   ;;  %vm587_vm4 = vcmask (!%p390_p9), 64512   ;;  %v1331_v7 = vld [vmem:[%s1746_s5 + $0x10] sm:$0xff] (!%p390_p9)   ;;  %vm804_vm5 = vcmask (!%p390_p9), 523264  }
  0x14   : > { %1211 = vmatprep.subr.bf16.mxu1 (!%p390_p9), %v1423_v8  ;;  %1237 = vmatprep.mubr.msk.bf16.mxu0 (!%p390_p9), %vm1424_vm1, %v1423_v8  ;;  %s1428_s22 = smov (!%p390_p9), 112   ;;  %s1429_s23 = smov (!%p390_p9), 32  }
  0x15   : > { %s1178_s30 = sshll.u32 (!%p390_p9), %s1522_s29, 7 }
  0x17   : > { %1212 = vmatpush3.bf16.msra.mxu1 (!%p390_p9), %v1328_v9  ;;  %v1332_v9 = vld [vmem:[%s1746_s5 + $0x18] sm:$0xff] (!%p390_p9)  }
  0x18   : > { %1217 = vmatprep.subr.bf16.mxu1 (!%p390_p9), %v1423_v8  ;;  %v1145_v14 = vld [vmem:[%s1761_s1] ss:$0 sm:$0xff] (!%p390_p9)  ;;  %s1698_s1 = scalar_lea.hbm (!%p390_p9), %s1754_s13, %s1178_s30 }
  0x19   : > { %s433_s20 = scalar_select %p432_p10, %s1522_s29, 1  ;;  %v1146_v16 = vld [vmem:[%s1762_s2] ss:$0 sm:$0xff] }
  0x1b   : > { %s1144_s21 = sshll.u32 %s433_s20, 3  ;;  %s1426_s20 = smov 96  }
  0x1c   : > { %s435_s24 = scalar_lea.vmem %s1760_s0, %s1144_s21  ;;  %s1427_s21 = smov 80  }
  0x1d   : > { %v1554_v0 = vld [vmem:[%s435_s24] sm:$0xff] }
  0x1e   : > { %v441_v1 = vsel %vm440_vm0, %v1554_v0, 0.0 }
  0x1f   : > { %442 = vadd.xlane.f32.xlu0 %v441_v1 }
  0xac   : > { %v443_v2 = vpop.xlane.xlu0 %442 }
  0xad   : > { %v445_v3 = vmul.f32 0.03125, %v443_v2 }
  0xaf   : > { %v446_v4 = vsub.f32 %v1554_v0, %v445_v3 }
  0xb1   : > { %v447_v5 = vmul.f32 %v446_v4, %v446_v4 }
  0xb3   : > { %v448_v6 = vsel %vm440_vm0, %v447_v5, 0.0  ;;  %v1329_v5 = vld [vmem:[%s1746_s5] sm:$0xff]  }
  0xb4   : > { %449 = vadd.xlane.f32.xlu0 %v448_v6  ;;  %v1330_v6 = vld [vmem:[%s1746_s5 + $0x8] sm:$0xff]  }
 0x141   : > { %v450_v10 = vpop.xlane.xlu0 %449 }
 0x142   : > { %v451_v11 = vmul.f32 0.03125, %v450_v10 }
 0x144   : > { %v452_v12 = vadd.f32 1e-05, %v451_v11 }
 0x146   : > { %1343 = vrsqrt.f32 %v452_v12 }
 0x150   : > { %v1344_v13 = vpop.eup %1343 }
 0x151   : > { %v454_v15 = vmul.f32 %v1344_v13, %v446_v4 }
 0x153   : > { %v461_v17 = vmul.f32 %v1145_v14, %v454_v15 }
 0x155   : > { %v468_v18 = vadd.f32 %v1146_v16, %v461_v17  ;;  %v1155_v17 = vld [vmem:[%s1747_s6] ss:$0 sm:$0xff] }
 0x157   : > { %v469_v19 = vpack.c.bf16 %v468_v18, %v468_v18 }
 0x159   : > { %1214 = vmatmul.mubr.msk.bf16.vlgmr.msra.gmra.mrb[0].mxu1 %vm440_vm0, %v469_v19 }
 0x15a   : > { %1219 = vmatprep.mubr.msk.bf16.mxu1 %vm1424_vm1, %v1423_v8 }
 0x22c   : > { %v530_v21 = vpop.f32.mrb[0].mxu1 }
 0x22d   : > { %v531_v22 = vadd.f32 %v1147_v20, %v530_v21  ;;  %v1215_v23 = vpop.f32.mrb[1].mxu1 }
 0x22e   : > { %v533_v24 = vpop.f32.mrb[2].mxu1 }
 0x22f   : > { %v536_v25 = vpack.c.bf16 %v531_v22, %v531_v22  ;;  %v1216_v26 = vpop.f32.mrb[3].mxu1 }
 0x231   : > { %600 = vrot.lane.b32.xlu0 %v536_v25, %s1425_s16  ;;  %538 = vrot.lane.b32.xlu1 %v536_v25, %s1426_s20  ;;  %s429_s20 = sand.u32 1, %s1413_s26  }
 0x232   : > { %s1067_s29 = scalar_lea.sflag [#allocation3], %s429_s20 }
 0x2a3   : > { %v539_v27 = vpop.permute.xlu1 %538  ;;  %v601_v29 = vpop.permute.xlu0 %600 }
 0x2a4   : > { %v545_v28 = vsel %vm540_vm2, %v539_v27, 0  ;;  %v607_v30 = vsel %vm605_vm3, %v601_v29, 0 }
 0x2a5   : > { %1218 = vmatpush3.bf16.xpose.msra.mxu1 %v545_v28 }
 0x2a6   : > { %1223 = vmatprep.subr.bf16.mxu1 %v1423_v8 }
 0x2ac   : > { %1220 = vmatmul.mubr.msk.bf16.vlgmr.msra.gmra.mrb[4].mxu1 %vm540_vm2, %v536_v25 }
 0x2ad   : > { %1224 = vmatpush3.bf16.msra.mxu1 %v607_v30  ;;  %1225 = vmatprep.mubr.msk.bf16.mxu1 %vm1424_vm1, %v1423_v8  ;;  %v1333_v30 = vld [vmem:[%s1750_s9] sm:$0xff]  }
 0x2ae   : > { %1229 = vmatprep.subr.bf16.mxu1 %v1423_v8 }
 0x37f   : > { %v581_v31 = vpop.f32.mrb[4].mxu1 }
 0x380   : > { %v1221_v32 = vpop.f32.mrb[5].mxu1  ;;  %v588_v33 = vsel %vm587_vm4, %v581_v31, -inf }
 0x381   : > { %589 = vmax.xlane.f32.xlu1 %v588_v33  ;;  %v584_v34 = vpop.f32.mrb[6].mxu1 }
 0x382   : > { %v1222_v35 = vpop.f32.mrb[7].mxu1 }
 0x383   : > { %v1161_v35 = vld [vmem:[%s1748_s7] ss:$0 sm:$0xff] }
 0x40e   : > { %v590_v36 = vpop.xlane.xlu1 %589 }
 0x40f   : > { %v591_v37 = vsub.f32 %v581_v31, %v590_v36 }
 0x411   : > { %v592_v38 = vmul.f32 1.442695, %v591_v37  ;;  %v1162_v37 = vld [vmem:[%s1749_s8] ss:$0 sm:$0xff] }
 0x413   : > { %1345 = vpow2.f32 %v592_v38 }
 0x41d   : > { %v1346_v39 = vpop.eup %1345 }
 0x41e   : > { %v594_v40 = vsel %vm587_vm4, %v1346_v39, 0.0 }
 0x41f   : > { %595 = vadd.xlane.f32.xlu0 %v594_v40 }
 0x435   : > { %651 = vrot.lane.b32.xlu0 %v536_v25, %s1427_s21  ;;  %s1143_s21 = sshll.u32 %s429_s20, 3 }
 0x436   : > { %s431_s15 = scalar_lea.vmem [#allocation2], %s1143_s21 }
 0x439   : > { %649 = vrot.lane.b32.xlu0 %v536_v25, %s1428_s22  ;;  %s1430_s22 = smov [#allocation2]  }
 0x43a   : > { %s1363_s24 = sshll.u32 %s1430_s22, 4  ;;  %s1364_s24 = int_to_ptr.vmem [resolvable:$false] %s1363_s24 }
 0x43b   : > { %s1365_s2 = scalar_lea.vmem %s1364_s24, 256 }
 0x4ac   : > { %v596_v41 = vpop.xlane.xlu0 %595 }
 0x4ad   : > { %1347 = vrcp.f32 %v596_v41  ;;  %v1335_v41 = vld [vmem:[%s1752_s11] sm:$0xff]  }
 0x4b0   : > { %v652_v44 = vpop.permute.xlu0 %651 }
 0x4b1   : > { %v657_v46 = vsel %vm540_vm2, %v652_v44, 0  ;;  %v1338_v44 = vld [vmem:[%s1752_s11 + $0x18] sm:$0xff]  }
 0x4b4   : > { %v650_v47 = vpop.permute.xlu0 %649 }
 0x4b7   : > { %v1348_v42 = vpop.eup %1347 }
 0x4b8   : > { %v598_v43 = vmul.f32 %v1348_v42, %v1346_v39  ;;  %v1336_v42 = vld [vmem:[%s1752_s11 + $0x8] sm:$0xff]  }
 0x4ba   : > { %v599_v45 = vpack.c.bf16 %v598_v43, %v598_v43  ;;  %v1337_v43 = vld [vmem:[%s1752_s11 + $0x10] sm:$0xff]  }
 0x4bc   : > { %1226 = vmatmul.mubr.msk.bf16.vlgmr.msra.gmra.mrb[8].mxu1 %vm587_vm4, %v599_v45  ;;  %v1339_v45 = vld [vmem:[%s1752_s11 + $0x20] sm:$0xff]  }
 0x4bd   : > { %1230 = vmatpush3.bf16.xpose.msra.mxu1 %v657_v46  ;;  %1231 = vmatprep.mubr.msk.bf16.mxu1 %vm1424_vm1, %v1423_v8  ;;  %v1340_v46 = vld [vmem:[%s1752_s11 + $0x28] sm:$0xff]  }
 0x4be   : > { %1241 = vmatprep.subr.bf16.mxu1 %v1423_v8 }
 0x4c4   : > { %1232 = vmatmul.mubr.msk.bf16.vlgmr.msra.gmra.mrb[12].mxu1 %vm540_vm2, %v650_v47  ;;  %v1341_v47 = vld [vmem:[%s1752_s11 + $0x30] sm:$0xff]  }
 0x4c5   : > { %1249 = vmatprep.mubr.msk.bf16.mxu1 %vm1424_vm1, %v1423_v8  ;;  %1242 = vmatpush3.bf16.msra.mxu1 %v1329_v5 }
 0x4c6   : > { %1243 = vmatprep.subr.bf16.mxu1 %v1423_v8 }
 0x4c9   : > { %1244 = vmatpush3.bf16.msra.mxu1 %v1330_v6 }
 0x4ca   : > { %1245 = vmatprep.subr.bf16.mxu1 %v1423_v8 }
 0x4cd   : > { %1246 = vmatpush3.bf16.msra.mxu1 %v1331_v7 }
 0x4ce   : > { %1247 = vmatprep.subr.bf16.mxu1 %v1423_v8 }
 0x4d1   : > { %1248 = vmatpush3.bf16.msra.mxu1 %v1332_v9 }
 0x58f   : > { %v643_v48 = vpop.f32.mrb[8].mxu1 }
 0x590   : > { %v1227_v49 = vpop.f32.mrb[9].mxu1 }
 0x591   : > { %v646_v50 = vpop.f32.mrb[10].mxu1  ;;  %v1163_v49 = vld [vmem:[%s1751_s10] ss:$0 sm:$0xff] }
 0x592   : > { %v1228_v51 = vpop.f32.mrb[11].mxu1 }
 0x597   : > { %v693_v52 = vpop.f32.mrb[12].mxu1 }
 0x598   : > { %v1233_v53 = vpop.f32.mrb[13].mxu1  ;;  %v699_v54 = vsel %vm587_vm4, %v693_v52, -inf }
 0x599   : > { %700 = vmax.xlane.f32.xlu1 %v699_v54  ;;  %v696_v55 = vpop.f32.mrb[14].mxu1 }
 0x59a   : > { %v1234_v56 = vpop.f32.mrb[15].mxu1 }
 0x5aa   : > { %711 = vrot.lane.b32.xlu1 %v536_v25, %s1429_s23 }
 0x626   : > { %v701_v57 = vpop.xlane.xlu1 %700 }
 0x627   : > { %v702_v58 = vsub.f32 %v693_v52, %v701_v57 }
 0x629   : > { %v703_v59 = vmul.f32 1.442695, %v702_v58 }
 0x62a   : > { %v712_v60 = vpop.permute.xlu1 %711 }
 0x62b   : > { %1349 = vpow2.f32 %v703_v59  ;;  %v717_v61 = vsel %vm605_vm3, %v712_v60, 0  ;;  %v1168_v60 = vld [vmem:[%s1753_s12] ss:$0 sm:$0xff] }
 0x62c   : > { %1236 = vmatpush3.bf16.msra.mxu0 %v717_v61 }
 0x62d   : > { %1253 = vmatprep.subr.bf16.mxu0 %v1423_v8 }
 0x635   : > { %v1350_v62 = vpop.eup %1349 }
 0x636   : > { %v705_v63 = vsel %vm587_vm4, %v1350_v62, 0.0 }
 0x637   : > { %706 = vadd.xlane.f32.xlu0 %v705_v63 }
 0x6c4   : > { %v707_v1 = vpop.xlane.xlu0 %706 }
 0x6c5   : > { %1351 = vrcp.f32 %v707_v1 }
 0x6cf   : > { %v1352_v2 = vpop.eup %1351 }
 0x6d0   : > { %v709_v3 = vmul.f32 %v1352_v2, %v1350_v62 }
 0x6d2   : > { %v710_v4 = vpack.c.bf16 %v709_v3, %v709_v3 }
 0x6d4   : > { %1238 = vmatmul.mubr.msk.bf16.vlgmr.msra.gmra.mrb[0].mxu0 %vm587_vm4, %v710_v4 }
 0x6d5   : > { %1257 = vmatprep.mubr.msk.bf16.mxu0 %vm1424_vm1, %v1423_v8  ;;  %1254 = vmatpush3.bf16.msra.mxu0 %v1333_v30 }
 0x6d6   : > { %1255 = vmatprep.subr.bf16.mxu0 %v1423_v8 }
 0x7a7   : > { %v753_v10 = vpop.f32.mrb[0].mxu0 }
 0x7a8   : > { %760 = vrot.lane.b32.xlu1 %v753_v10, %s1429_s23  ;;  %v1239_v11 = vpop.f32.mrb[1].mxu0  ;;  %s1080_s23 = sshll.u32 %s431_s15, 4  ;;  %s1700_s23 = int_to_ptr.vmem [resolvable:$true] %s1080_s23 }
 0x7a9   : > { %v756_v12 = vpop.f32.mrb[2].mxu0  ;;  %s1359_s21 = scalar_lea.vmem %s1700_s23, 128  ;;  %p1366_p0 = scmp.lt.s32.totalorder %s1700_s23, %s1364_s24 }
 0x7aa   : > { %v1240_v13 = vpop.f32.mrb[3].mxu0  ;;  %p1360_p11 = scmp.ne.s32.totalorder %s1700_s23, %s1359_s21  ;;  %p1367_p1 = scmp.lt.s32.totalorder %s1365_s2, %s1359_s21 }
 0x7ac   : > { %p1361_p12 = pnand %p1360_p11, %p1539_p5  ;;  %p1368_p2 = por %p1367_p1, %p1366_p0 }
 0x7ae   : > { %p1362_p13 = pneg %p1361_p12 }
 0x7b0   : > { %p1369_p3 = pnand %p1368_p2, %p1362_p13 }
 0x81a   : > { %v761_v14 = vpop.permute.xlu1 %760 }
 0x81b   : > { %v763_v15 = vsel %vm440_vm0, %v643_v48, %v761_v14  ;;  %v1342_v48 = vld [vmem:[%s1752_s11 + $0x38] sm:$0xff]  }
 0x81c   : > { %v764_v16 = vpack.c.bf16 %v763_v15, %v763_v15 }
 0x81e   : > { %1250 = vmatmul.mubr.msk.bf16.vlgmr.msra.gmra.mrb[16].mxu1 %vm804_vm5, %v764_v16 }
 0x8f1   : > { %v842_v18 = vpop.f32.mrb[16].mxu1 }
 0x8f2   : > { %v843_v19 = vadd.f32 %v1155_v17, %v842_v18  ;;  %v1251_v20 = vpop.f32.mrb[17].mxu1 }
 0x8f3   : > { %v845_v21 = vpop.f32.mrb[18].mxu1 }
 0x8f4   : > { %v1632_v22 = vadd.f32 %v843_v19, %v1554_v0  ;;  %v1252_v23 = vpop.f32.mrb[19].mxu1  ;;  %v1334_v0 = vld [vmem:[%s1750_s9 + $0x8] sm:$0xff]  }
 0x8f5   : > { %1256 = vmatpush3.bf16.msra.mxu0 %v1334_v0 }
 0x8f6   : > { %v851_v24 = vsel %vm440_vm0, %v1632_v22, 0.0  ;;  %1261 = vmatprep.subr.bf16.mxu0 %v1423_v8 }
 0x8f7   : > { %852 = vadd.xlane.f32.xlu1 %v851_v24 }
 0x984   : > { %v853_v25 = vpop.xlane.xlu1 %852 }
 0x985   : > { %v854_v26 = vmul.f32 0.03125, %v853_v25 }
 0x987   : > { %v855_v27 = vsub.f32 %v1632_v22, %v854_v26 }
 0x989   : > { %v856_v28 = vmul.f32 %v855_v27, %v855_v27 }
 0x98b   : > { %v857_v29 = vsel %vm440_vm0, %v856_v28, 0.0 }
 0x98c   : > { %858 = vadd.xlane.f32.xlu0 %v857_v29 }
 0xa19   : > { %v859_v31 = vpop.xlane.xlu0 %858 }
 0xa1a   : > { %v860_v32 = vmul.f32 0.03125, %v859_v31 }
 0xa1c   : > { %v861_v33 = vadd.f32 1e-05, %v860_v32 }
 0xa1e   : > { %1353 = vrsqrt.f32 %v861_v33 }
 0xa28   : > { %v1354_v34 = vpop.eup %1353 }
 0xa29   : > { %v863_v36 = vmul.f32 %v1354_v34, %v855_v27 }
 0xa2b   : > { %v870_v38 = vmul.f32 %v1161_v35, %v863_v36 }
 0xa2d   : > { %v877_v39 = vadd.f32 %v1162_v37, %v870_v38 }
 0xa2f   : > { %v878_v40 = vpack.c.bf16 %v877_v39, %v877_v39 }
 0xa31   : > { %1258 = vmatmul.mubr.msk.bf16.vlgmr.msra.gmra.mrb[4].mxu0 %vm440_vm0, %v878_v40 }
 0xa32   : > { %1277 = vmatprep.mubr.msk.bf16.mxu0 %vm1424_vm1, %v1423_v8  ;;  %1262 = vmatpush3.bf16.msra.mxu0 %v1335_v41 }
 0xa33   : > { %1263 = vmatprep.subr.bf16.mxu0 %v1423_v8 }
 0xa36   : > { %1264 = vmatpush3.bf16.msra.mxu0 %v1336_v42 }
 0xa37   : > { %1265 = vmatprep.subr.bf16.mxu0 %v1423_v8 }
 0xa3a   : > { %1266 = vmatpush3.bf16.msra.mxu0 %v1337_v43 }
 0xa3b   : > { %1267 = vmatprep.subr.bf16.mxu0 %v1423_v8 }
 0xa3e   : > { %1268 = vmatpush3.bf16.msra.mxu0 %v1338_v44 }
 0xa3f   : > { %1269 = vmatprep.subr.bf16.mxu0 %v1423_v8 }
 0xa42   : > { %1270 = vmatpush3.bf16.msra.mxu0 %v1339_v45 }
 0xa43   : > { %1271 = vmatprep.subr.bf16.mxu0 %v1423_v8 }
 0xa46   : > { %1272 = vmatpush3.bf16.msra.mxu0 %v1340_v46 }
 0xa47   : > { %1273 = vmatprep.subr.bf16.mxu0 %v1423_v8 }
 0xa4a   : > { %1274 = vmatpush3.bf16.msra.mxu0 %v1341_v47 }
 0xa4b   : > { %1275 = vmatprep.subr.bf16.mxu0 %v1423_v8 }
 0xa4e   : > { %1276 = vmatpush3.bf16.msra.mxu0 %v1342_v48 }
 0xb04   : > { %v939_v50 = vpop.f32.mrb[4].mxu0 }
 0xb05   : > { %v940_v51 = vadd.f32 %v1163_v49, %v939_v50  ;;  %v1259_v52 = vpop.f32.mrb[5].mxu0 }
 0xb06   : > { %v942_v53 = vpop.f32.mrb[6].mxu0 }
 0xb07   : > { %v1167_v54 = vmul.f32 -1.442695, %v940_v51  ;;  %v1260_v55 = vpop.f32.mrb[7].mxu0 }
 0xb09   : > { %1355 = vpow2.f32 %v1167_v54 }
 0xb13   : > { %v1356_v56 = vpop.eup %1355 }
 0xb14   : > { %v948_v8 = vadd.f32 1.0, %v1356_v56 }
 0xb16   : > { %1357 = vrcp.f32 %v948_v8 }
 0xb20   : > { %v1358_v57 = vpop.eup %1357 }
 0xb21   : > { %v951_v58 = vmul.f32 %v1358_v57, %v940_v51 }
 0xb23   : > { %v952_v59 = vpack.c.bf16 %v951_v58, %v951_v58 }
 0xb25   : > { %1278 = vmatmul.mubr.bf16.vlgmr.msra.gmra.mrb[8].mxu0 %v952_v59 }
 0xbf8   : > { %v1058_v61 = vpop.f32.mrb[8].mxu0 }
 0xbf9   : > { %v1059_v62 = vadd.f32 %v1168_v60, %v1058_v61  ;;  %v1279_v63 = vpop.f32.mrb[9].mxu0 }
 0xbfa   : > { %v1061_v1 = vpop.f32.mrb[10].mxu0 }
 0xbfb   : > { %v1064_v2 = vadd.f32 %v1059_v62, %v1632_v22  ;;  %v1280_v3 = vpop.f32.mrb[11].mxu0 }
 0xbfd   : > { %1065 = vst.msk [vmem:[%s431_s15] sm:$0xff] %vm440_vm0, %v1064_v2 }
 0xbfe   : > { %1372 = shalt.err (!%p1369_p3)
}
 0xbff   : > { %s1373_s0 = scalar_lea.hbm %s1698_s1, 128  ;;  %s1377_s15 = scalar_lea.hbm %s1754_s13, 256 }
 0xc00   : > { %p1374_p4 = scmp.ne.s32.totalorder %s1698_s1, %s1373_s0  ;;  %p1378_p9 = scmp.lt.u32.totalorder %s1698_s1, %s1754_s13 }
 0xc01   : > { %p1379_p10 = scmp.lt.u32.totalorder %s1377_s15, %s1373_s0  ;;  %p1381_p12 = scmp.lt.u32.totalorder %s1373_s0, %s1698_s1 }
 0xc02   : > { %p1375_p7 = pnand %p1374_p4, %p1539_p5 }
 0xc03   : > { %p1380_p11 = por %p1379_p10, %p1378_p9 }
 0xc04   : > { %p1376_p8 = pneg %p1375_p7 }
 0xc05   : > { %p1382_p13 = por %p1381_p12, %p1380_p11 }
 0xc07   : > { %p1383_p0 = pnand %p1382_p13, %p1376_p8 }
 0xc09   : > { %1386 = shalt.err (!%p1383_p0)
}
 0xc0a   : > { %1281 = dma.vmem_to_hbm [thread:$0]  (%p1539_p5), %s1700_s23, 128, %s1698_s1, %s1067_s29  }
 0xc0b PF: > { %p1287_p1 = scmp.ge.s32.totalorder %s1421_s28, 2  ;;  %s1092_s2 = sand.u32 1, %s1409_s25  }
 0xc0c   : > { %s1093_s21 = scalar_lea.sflag [#allocation3], %s1092_s2 }
 0xc0d   : > { %p1284_p2 = pnand %p1287_p1, %p1543_p6 }
 0xc0f   : > { %1404 = dma.done.wait (!%p1284_p2), %s1093_s21, 128  }
 0xc10   : > { %1406 = vsyncadd (!%p1284_p2), %s1093_s21, 4294967168  ;;  %p23_p3 = scmp.ge.s32.totalorder %s1526_s14, 4   ;;  %s1763_s25 = smov %s1413_s26 }
 0xc11   : > { %s1764_s26 = smov %s1417_s27  ;;  %s1765_s27 = smov %s1537_s17 }
 0xc12   : > { %s1766_s28 = smov %s1526_s14  ;;  %25 = sbr.rel (!%p23_p3) target bundleno = 7 (0x7), region = 107 }
 0xc19   :  { %1098 = vsyncpa [#allocation3], 1 }
 0xc1a   :  { %1100 = vsyncpa [#allocation3 + $0x1], 1 }

// kernel: tpu_custom_call.1
= control target key start
LH: loop header
LB: loop body
LE: loop exit
PB: predicated region body
PF: predicated region fallthrough
CT: control target
= control target key end

     0   :  { %s1741_s0 = inlined_call_operand.vmem [shape: f32[2,8,32], index: 0, kind: input, shape index: {}]   ;;  %s1742_s1 = inlined_call_operand.vmem [shape: f32[1,32], index: 1, kind: input, shape index: {}]   ;;  %s1743_s2 = inlined_call_operand.vmem [shape: f32[1,32], index: 2, kind: input, shape index: {}]   ;;  %s1744_s3 = inlined_call_operand.vmem [shape: bf16[32,128], index: 3, kind: input, shape index: {}]   ;;  %s1745_s4 = inlined_call_operand.vmem [shape: f32[1,128], index: 4, kind: input, shape index: {}]   ;;  %s1746_s5 = inlined_call_operand.vmem [shape: bf16[64,32], index: 5, kind: input, shape index: {}]   ;;  %s1747_s6 = inlined_call_operand.vmem [shape: f32[1,32], index: 6, kind: input, shape index: {}]   ;;  %s1748_s7 = inlined_call_operand.vmem [shape: f32[1,32], index: 7, kind: input, shape index: {}]   ;;  %s1749_s8 = inlined_call_operand.vmem [shape: f32[1,32], index: 8, kind: input, shape index: {}]   ;;  %s1750_s9 = inlined_call_operand.vmem [shape: bf16[32,128], index: 9, kind: input, shape index: {}]   ;;  %s1751_s10 = inlined_call_operand.vmem [shape: f32[1,128], index: 10, kind: input, shape index: {}]   ;;  %s1752_s11 = inlined_call_operand.vmem [shape: bf16[128,32], index: 11, kind: input, shape index: {}]   ;;  %s1753_s12 = inlined_call_operand.vmem [shape: f32[1,32], index: 12, kind: input, shape index: {}]   ;;  %s1754_s13 = inlined_call_operand.hbm [shape: f32[2,8,32], index: 13, kind: output, shape index: {}]  }
   0x1   :  { %1755 = sst [smem:[#allocation5_spill]] %s1741_s0 }
   0x2   :  { %1756 = sst [smem:[#allocation6_spill]] %s1742_s1 }
   0x3   :  { %1757 = sst [smem:[#allocation7_spill]] %s1743_s2 }
   0x4   :  { %18 = vsyncpa [#allocation3], 0 }
   0x5   :  { %20 = vsyncpa [#allocation3 + $0x1], 0  ;;  %s1501_s25 = smov 0   ;;  %s1503_s26 = smov 0  }
   0x6   :  { %s1505_s27 = smov 0   ;;  %s1507_s28 = smov 0  }
   0x7 LB: > { %s1522_s29 = sadd.s32 4294967295, %s1421_s28   ;;  %s1139_s30 = sadd.s32 4294967294, %s1421_s28   ;;  %s1421_s28 = sphi %s1507_s28, %s1766_s28   ;;  %s1417_s27 = sphi %s1505_s27, %s1765_s27   ;;  %s1413_s26 = sphi %s1503_s26, %s1764_s26   ;;  %s1409_s25 = sphi %s1501_s25, %s1763_s25  }
   0x8   : > { %s1526_s14 = sadd.s32 1, %s1421_s28   ;;  %s311_s15 = sadd.s32 1, %s1417_s27 }
   0x9   : > { %s308_s16 = ssub.s32 %s1421_s28, %s1526_s14  ;;  %p321_p0 = scmp.ne.s32.totalorder %s1417_s27, %s1413_s26 }
   0xa   : > { %p309_p1 = scmp.eq.s32.totalorder %s308_s16, 0  ;;  %p322_p2 = scmp.eq.s32.totalorder %s1522_s29, 1 }
   0xb   : > { %p327_p3 = scmp.ne.s32.totalorder %s1413_s26, %s1409_s25  ;;  %p328_p4 = scmp.eq.s32.totalorder %s1139_s30, 1 }
   0xc   : > { %s1537_s17 = scalar_select %p309_p1, %s1417_s27, %s311_s15  }
   0xd   : > { %p1539_p5 = por %p322_p2, %p321_p0  ;;  %p1543_p6 = por %p328_p4, %p327_p3 }
   0xe   : > { %p1142_p7 = scmp.ge.s32.totalorder %s1421_s28, 1  ;;  %p389_p8 = scmp.lt.s32.totalorder %s1421_s28, 3 }
  0x10   : > { %p390_p9 = pnand %p1142_p7, %p389_p8 }
  0x11   : > { %p432_p10 = scmp.lt.s32.totalorder (!%p390_p9), %s1522_s29, 1  ;;  %vm440_vm0 = vcmask (!%p390_p9), 261120   ;;  %s1760_s0 = sld [smem:[#allocation5_spill]] (!%p390_p9)  ;;  %v1327_v7 = vld [vmem:[%s1744_s3] sm:$0xff] (!%p390_p9)   ;;  %v1423_v8 = vmov (!%p390_p9), 0.0   ;;  %vm1424_vm1 = vmmov (!%p390_p9), 0  }
  0x12   : > { %393 = sbr.rel (%p390_p9) target bundleno = 3083 (0xc0b), region = 72  ;;  %1209 = vmatprep.subr.bf16.mxu1 (!%p390_p9), %v1423_v8  ;;  %1213 = vmatprep.mubr.msk.bf16.mxu1 (!%p390_p9), %vm1424_vm1, %v1423_v8  ;;  %v1328_v9 = vld [vmem:[%s1744_s3 + $0x8] sm:$0xff] (!%p390_p9)   ;;  %s1761_s1 = sld [smem:[#allocation6_spill]] (!%p390_p9)  ;;  %v1147_v20 = vld [vmem:[%s1745_s4] ss:$0 sm:$0xff] (!%p390_p9)  ;;  %vm540_vm2 = vcmask (!%p390_p9), 130048  }
  0x13   : > { %1210 = vmatpush3.bf16.msra.mxu1 (!%p390_p9), %v1327_v7  ;;  %1235 = vmatprep.subr.bf16.mxu0 (!%p390_p9), %v1423_v8  ;;  %s1762_s2 = sld [smem:[#allocation7_spill]] (!%p390_p9)  ;;  %s1425_s16 = smov (!%p390_p9), 64   ;;  %vm605_vm3 = vcmask (!%p390_p9), 1043456   ;;  %vm587_vm4 = vcmask (!%p390_p9), 64512   ;;  %v1331_v7 = vld [vmem:[%s1746_s5 + $0x10] sm:$0xff] (!%p390_p9)   ;;  %vm804_vm5 = vcmask (!%p390_p9), 523264  }
  0x14   : > { %1211 = vmatprep.subr.bf16.mxu1 (!%p390_p9), %v1423_v8  ;;  %1237 = vmatprep.mubr.msk.bf16.mxu0 (!%p390_p9), %vm1424_vm1, %v1423_v8  ;;  %s1428_s22 = smov (!%p390_p9), 112   ;;  %s1429_s23 = smov (!%p390_p9), 32  }
  0x15   : > { %s1178_s30 = sshll.u32 (!%p390_p9), %s1522_s29, 7 }
  0x17   : > { %1212 = vmatpush3.bf16.msra.mxu1 (!%p390_p9), %v1328_v9  ;;  %v1332_v9 = vld [vmem:[%s1746_s5 + $0x18] sm:$0xff] (!%p390_p9)  }
  0x18   : > { %1217 = vmatprep.subr.bf16.mxu1 (!%p390_p9), %v1423_v8  ;;  %v1145_v14 = vld [vmem:[%s1761_s1] ss:$0 sm:$0xff] (!%p390_p9)  ;;  %s1698_s1 = scalar_lea.hbm (!%p390_p9), %s1754_s13, %s1178_s30 }
  0x19   : > { %s433_s20 = scalar_select %p432_p10, %s1522_s29, 1  ;;  %v1146_v16 = vld [vmem:[%s1762_s2] ss:$0 sm:$0xff] }
  0x1b   : > { %s1144_s21 = sshll.u32 %s433_s20, 3  ;;  %s1426_s20 = smov 96  }
  0x1c   : > { %s435_s24 = scalar_lea.vmem %s1760_s0, %s1144_s21  ;;  %s1427_s21 = smov 80  }
  0x1d   : > { %v1554_v0 = vld [vmem:[%s435_s24] sm:$0xff] }
  0x1e   : > { %v441_v1 = vsel %vm440_vm0, %v1554_v0, 0.0 }
  0x1f   : > { %442 = vadd.xlane.f32.xlu0 %v441_v1 }
  0xac   : > { %v443_v2 = vpop.xlane.xlu0 %442 }
  0xad   : > { %v445_v3 = vmul.f32 0.03125, %v443_v2 }
  0xaf   : > { %v446_v4 = vsub.f32 %v1554_v0, %v445_v3 }
  0xb1   : > { %v447_v5 = vmul.f32 %v446_v4, %v446_v4 }
  0xb3   : > { %v448_v6 = vsel %vm440_vm0, %v447_v5, 0.0  ;;  %v1329_v5 = vld [vmem:[%s1746_s5] sm:$0xff]  }
  0xb4   : > { %449 = vadd.xlane.f32.xlu0 %v448_v6  ;;  %v1330_v6 = vld [vmem:[%s1746_s5 + $0x8] sm:$0xff]  }
 0x141   : > { %v450_v10 = vpop.xlane.xlu0 %449 }
 0x142   : > { %v451_v11 = vmul.f32 0.03125, %v450_v10 }
 0x144   : > { %v452_v12 = vadd.f32 1e-05, %v451_v11 }
 0x146   : > { %1343 = vrsqrt.f32 %v452_v12 }
 0x150   : > { %v1344_v13 = vpop.eup %1343 }
 0x151   : > { %v454_v15 = vmul.f32 %v1344_v13, %v446_v4 }
 0x153   : > { %v461_v17 = vmul.f32 %v1145_v14, %v454_v15 }
 0x155   : > { %v468_v18 = vadd.f32 %v1146_v16, %v461_v17  ;;  %v1155_v17 = vld [vmem:[%s1747_s6] ss:$0 sm:$0xff] }
 0x157   : > { %v469_v19 = vpack.c.bf16 %v468_v18, %v468_v18 }
 0x159   : > { %1214 = vmatmul.mubr.msk.bf16.vlgmr.msra.gmra.mrb[0].mxu1 %vm440_vm0, %v469_v19 }
 0x15a   : > { %1219 = vmatprep.mubr.msk.bf16.mxu1 %vm1424_vm1, %v1423_v8 }
 0x22c   : > { %v530_v21 = vpop.f32.mrb[0].mxu1 }
 0x22d   : > { %v531_v22 = vadd.f32 %v1147_v20, %v530_v21  ;;  %v1215_v23 = vpop.f32.mrb[1].mxu1 }
 0x22e   : > { %v533_v24 = vpop.f32.mrb[2].mxu1 }
 0x22f   : > { %v536_v25 = vpack.c.bf16 %v531_v22, %v531_v22  ;;  %v1216_v26 = vpop.f32.mrb[3].mxu1 }
 0x231   : > { %600 = vrot.lane.b32.xlu0 %v536_v25, %s1425_s16  ;;  %538 = vrot.lane.b32.xlu1 %v536_v25, %s1426_s20  ;;  %s429_s20 = sand.u32 1, %s1413_s26  }
 0x232   : > { %s1067_s29 = scalar_lea.sflag [#allocation3], %s429_s20 }
 0x2a3   : > { %v539_v27 = vpop.permute.xlu1 %538  ;;  %v601_v29 = vpop.permute.xlu0 %600 }
 0x2a4   : > { %v545_v28 = vsel %vm540_vm2, %v539_v27, 0  ;;  %v607_v30 = vsel %vm605_vm3, %v601_v29, 0 }
 0x2a5   : > { %1218 = vmatpush3.bf16.xpose.msra.mxu1 %v545_v28 }
 0x2a6   : > { %1223 = vmatprep.subr.bf16.mxu1 %v1423_v8 }
 0x2ac   : > { %1220 = vmatmul.mubr.msk.bf16.vlgmr.msra.gmra.mrb[4].mxu1 %vm540_vm2, %v536_v25 }
 0x2ad   : > { %1224 = vmatpush3.bf16.msra.mxu1 %v607_v30  ;;  %1225 = vmatprep.mubr.msk.bf16.mxu1 %vm1424_vm1, %v1423_v8  ;;  %v1333_v30 = vld [vmem:[%s1750_s9] sm:$0xff]  }
 0x2ae   : > { %1229 = vmatprep.subr.bf16.mxu1 %v1423_v8 }
 0x37f   : > { %v581_v31 = vpop.f32.mrb[4].mxu1 }
 0x380   : > { %v1221_v32 = vpop.f32.mrb[5].mxu1  ;;  %v588_v33 = vsel %vm587_vm4, %v581_v31, -inf }
 0x381   : > { %589 = vmax.xlane.f32.xlu1 %v588_v33  ;;  %v584_v34 = vpop.f32.mrb[6].mxu1 }
 0x382   : > { %v1222_v35 = vpop.f32.mrb[7].mxu1 }
 0x383   : > { %v1161_v35 = vld [vmem:[%s1748_s7] ss:$0 sm:$0xff] }
 0x40e   : > { %v590_v36 = vpop.xlane.xlu1 %589 }
 0x40f   : > { %v591_v37 = vsub.f32 %v581_v31, %v590_v36 }
 0x411   : > { %v592_v38 = vmul.f32 1.442695, %v591_v37  ;;  %v1162_v37 = vld [vmem:[%s1749_s8] ss:$0 sm:$0xff] }
 0x413   : > { %1345 = vpow2.f32 %v592_v38 }
 0x41d   : > { %v1346_v39 = vpop.eup %1345 }
 0x41e   : > { %v594_v40 = vsel %vm587_vm4, %v1346_v39, 0.0 }
 0x41f   : > { %595 = vadd.xlane.f32.xlu0 %v594_v40 }
 0x435   : > { %651 = vrot.lane.b32.xlu0 %v536_v25, %s1427_s21  ;;  %s1143_s21 = sshll.u32 %s429_s20, 3 }
 0x436   : > { %s431_s15 = scalar_lea.vmem [#allocation2], %s1143_s21 }
 0x439   : > { %649 = vrot.lane.b32.xlu0 %v536_v25, %s1428_s22  ;;  %s1430_s22 = smov [#allocation2]  }
 0x43a   : > { %s1363_s24 = sshll.u32 %s1430_s22, 4  ;;  %s1364_s24 = int_to_ptr.vmem [resolvable:$false] %s1363_s24 }
 0x43b   : > { %s1365_s2 = scalar_lea.vmem %s1364_s24, 256 }
 0x4ac   : > { %v596_v41 = vpop.xlane.xlu0 %595 }
 0x4ad   : > { %1347 = vrcp.f32 %v596_v41  ;;  %v1335_v41 = vld [vmem:[%s1752_s11] sm:$0xff]  }
 0x4b0   : > { %v652_v44 = vpop.permute.xlu0 %651 }
 0x4b1   : > { %v657_v46 = vsel %vm540_vm2, %v652_v44, 0  ;;  %v1338_v44 = vld [vmem:[%s1752_s11 + $0x18] sm:$0xff]  }
 0x4b4   : > { %v650_v47 = vpop.permute.xlu0 %649 }
 0x4b7   : > { %v1348_v42 = vpop.eup %1347 }
 0x4b8   : > { %v598_v43 = vmul.f32 %v1348_v42, %v1346_v39  ;;  %v1336_v42 = vld [vmem:[%s1752_s11 + $0x8] sm:$0xff]  }
 0x4ba   : > { %v599_v45 = vpack.c.bf16 %v598_v43, %v598_v43  ;;  %v1337_v43 = vld [vmem:[%s1752_s11 + $0x10] sm:$0xff]  }
 0x4bc   : > { %1226 = vmatmul.mubr.msk.bf16.vlgmr.msra.gmra.mrb[8].mxu1 %vm587_vm4, %v599_v45  ;;  %v1339_v45 = vld [vmem:[%s1752_s11 + $0x20] sm:$0xff]  }
 0x4bd   : > { %1230 = vmatpush3.bf16.xpose.msra.mxu1 %v657_v46  ;;  %1231 = vmatprep.mubr.msk.bf16.mxu1 %vm1424_vm1, %v1423_v8  ;;  %v1340_v46 = vld [vmem:[%s1752_s11 + $0x28] sm:$0xff]  }
 0x4be   : > { %1241 = vmatprep.subr.bf16.mxu1 %v1423_v8 }
 0x4c4   : > { %1232 = vmatmul.mubr.msk.bf16.vlgmr.msra.gmra.mrb[12].mxu1 %vm540_vm2, %v650_v47  ;;  %v1341_v47 = vld [vmem:[%s1752_s11 + $0x30] sm:$0xff]  }
 0x4c5   : > { %1249 = vmatprep.mubr.msk.bf16.mxu1 %vm1424_vm1, %v1423_v8  ;;  %1242 = vmatpush3.bf16.msra.mxu1 %v1329_v5 }
 0x4c6   : > { %1243 = vmatprep.subr.bf16.mxu1 %v1423_v8 }
 0x4c9   : > { %1244 = vmatpush3.bf16.msra.mxu1 %v1330_v6 }
 0x4ca   : > { %1245 = vmatprep.subr.bf16.mxu1 %v1423_v8 }
 0x4cd   : > { %1246 = vmatpush3.bf16.msra.mxu1 %v1331_v7 }
 0x4ce   : > { %1247 = vmatprep.subr.bf16.mxu1 %v1423_v8 }
 0x4d1   : > { %1248 = vmatpush3.bf16.msra.mxu1 %v1332_v9 }
 0x58f   : > { %v643_v48 = vpop.f32.mrb[8].mxu1 }
 0x590   : > { %v1227_v49 = vpop.f32.mrb[9].mxu1 }
 0x591   : > { %v646_v50 = vpop.f32.mrb[10].mxu1  ;;  %v1163_v49 = vld [vmem:[%s1751_s10] ss:$0 sm:$0xff] }
 0x592   : > { %v1228_v51 = vpop.f32.mrb[11].mxu1 }
 0x597   : > { %v693_v52 = vpop.f32.mrb[12].mxu1 }
 0x598   : > { %v1233_v53 = vpop.f32.mrb[13].mxu1  ;;  %v699_v54 = vsel %vm587_vm4, %v693_v52, -inf }
 0x599   : > { %700 = vmax.xlane.f32.xlu1 %v699_v54  ;;  %v696_v55 = vpop.f32.mrb[14].mxu1 }
 0x59a   : > { %v1234_v56 = vpop.f32.mrb[15].mxu1 }
 0x5aa   : > { %711 = vrot.lane.b32.xlu1 %v536_v25, %s1429_s23 }
 0x626   : > { %v701_v57 = vpop.xlane.xlu1 %700 }
 0x627   : > { %v702_v58 = vsub.f32 %v693_v52, %v701_v57 }
 0x629   : > { %v703_v59 = vmul.f32 1.442695, %v702_v58 }
 0x62a   : > { %v712_v60 = vpop.permute.xlu1 %711 }
 0x62b   : > { %1349 = vpow2.f32 %v703_v59  ;;  %v717_v61 = vsel %vm605_vm3, %v712_v60, 0  ;;  %v1168_v60 = vld [vmem:[%s1753_s12] ss:$0 sm:$0xff] }
 0x62c   : > { %1236 = vmatpush3.bf16.msra.mxu0 %v717_v61 }
 0x62d   : > { %1253 = vmatprep.subr.bf16.mxu0 %v1423_v8 }
 0x635   : > { %v1350_v62 = vpop.eup %1349 }
 0x636   : > { %v705_v63 = vsel %vm587_vm4, %v1350_v62, 0.0 }
 0x637   : > { %706 = vadd.xlane.f32.xlu0 %v705_v63 }
 0x6c4   : > { %v707_v1 = vpop.xlane.xlu0 %706 }
 0x6c5   : > { %1351 = vrcp.f32 %v707_v1 }
 0x6cf   : > { %v1352_v2 = vpop.eup %1351 }
 0x6d0   : > { %v709_v3 = vmul.f32 %v1352_v2, %v1350_v62 }
 0x6d2   : > { %v710_v4 = vpack.c.bf16 %v709_v3, %v709_v3 }
 0x6d4   : > { %1238 = vmatmul.mubr.msk.bf16.vlgmr.msra.gmra.mrb[0].mxu0 %vm587_vm4, %v710_v4 }
 0x6d5   : > { %1257 = vmatprep.mubr.msk.bf16.mxu0 %vm1424_vm1, %v1423_v8  ;;  %1254 = vmatpush3.bf16.msra.mxu0 %v1333_v30 }
 0x6d6   : > { %1255 = vmatprep.subr.bf16.mxu0 %v1423_v8 }
 0x7a7   : > { %v753_v10 = vpop.f32.mrb[0].mxu0 }
 0x7a8   : > { %760 = vrot.lane.b32.xlu1 %v753_v10, %s1429_s23  ;;  %v1239_v11 = vpop.f32.mrb[1].mxu0  ;;  %s1080_s23 = sshll.u32 %s431_s15, 4  ;;  %s1700_s23 = int_to_ptr.vmem [resolvable:$true] %s1080_s23 }
 0x7a9   : > { %v756_v12 = vpop.f32.mrb[2].mxu0  ;;  %s1359_s21 = scalar_lea.vmem %s1700_s23, 128  ;;  %p1366_p0 = scmp.lt.s32.totalorder %s1700_s23, %s1364_s24 }
 0x7aa   : > { %v1240_v13 = vpop.f32.mrb[3].mxu0  ;;  %p1360_p11 = scmp.ne.s32.totalorder %s1700_s23, %s1359_s21  ;;  %p1367_p1 = scmp.lt.s32.totalorder %s1365_s2, %s1359_s21 }
 0x7ac   : > { %p1361_p12 = pnand %p1360_p11, %p1539_p5  ;;  %p1368_p2 = por %p1367_p1, %p1366_p0 }
 0x7ae   : > { %p1362_p13 = pneg %p1361_p12 }
 0x7b0   : > { %p1369_p3 = pnand %p1368_p2, %p1362_p13 }
 0x81a   : > { %v761_v14 = vpop.permute.xlu1 %760 }
 0x81b   : > { %v763_v15 = vsel %vm440_vm0, %v643_v48, %v761_v14  ;;  %v1342_v48 = vld [vmem:[%s1752_s11 + $0x38] sm:$0xff]  }
 0x81c   : > { %v764_v16 = vpack.c.bf16 %v763_v15, %v763_v15 }
 0x81e   : > { %1250 = vmatmul.mubr.msk.bf16.vlgmr.msra.gmra.mrb[16].mxu1 %vm804_vm5, %v764_v16 }
 0x8f1   : > { %v842_v18 = vpop.f32.mrb[16].mxu1 }
 0x8f2   : > { %v843_v19 = vadd.f32 %v1155_v17, %v842_v18  ;;  %v1251_v20 = vpop.f32.mrb[17].mxu1 }
 0x8f3   : > { %v845_v21 = vpop.f32.mrb[18].mxu1 }
 0x8f4   : > { %v1632_v22 = vadd.f32 %v843_v19, %v1554_v0  ;;  %v1252_v23 = vpop.f32.mrb[19].mxu1  ;;  %v1334_v0 = vld [vmem:[%s1750_s9 + $0x8] sm:$0xff]  }
 0x8f5   : > { %1256 = vmatpush3.bf16.msra.mxu0 %v1334_v0 }
 0x8f6   : > { %v851_v24 = vsel %vm440_vm0, %v1632_v22, 0.0  ;;  %1261 = vmatprep.subr.bf16.mxu0 %v1423_v8 }
 0x8f7   : > { %852 = vadd.xlane.f32.xlu1 %v851_v24 }
 0x984   : > { %v853_v25 = vpop.xlane.xlu1 %852 }
 0x985   : > { %v854_v26 = vmul.f32 0.03125, %v853_v25 }
 0x987   : > { %v855_v27 = vsub.f32 %v1632_v22, %v854_v26 }
 0x989   : > { %v856_v28 = vmul.f32 %v855_v27, %v855_v27 }
 0x98b   : > { %v857_v29 = vsel %vm440_vm0, %v856_v28, 0.0 }
 0x98c   : > { %858 = vadd.xlane.f32.xlu0 %v857_v29 }
 0xa19   : > { %v859_v31 = vpop.xlane.xlu0 %858 }
 0xa1a   : > { %v860_v32 = vmul.f32 0.03125, %v859_v31 }
 0xa1c   : > { %v861_v33 = vadd.f32 1e-05, %v860_v32 }
 0xa1e   : > { %1353 = vrsqrt.f32 %v861_v33 }
 0xa28   : > { %v1354_v34 = vpop.eup %1353 }
 0xa29   : > { %v863_v36 = vmul.f32 %v1354_v34, %v855_v27 }
 0xa2b   : > { %v870_v38 = vmul.f32 %v1161_v35, %v863_v36 }
 0xa2d   : > { %v877_v39 = vadd.f32 %v1162_v37, %v870_v38 }
 0xa2f   : > { %v878_v40 = vpack.c.bf16 %v877_v39, %v877_v39 }
 0xa31   : > { %1258 = vmatmul.mubr.msk.bf16.vlgmr.msra.gmra.mrb[4].mxu0 %vm440_vm0, %v878_v40 }
 0xa32   : > { %1277 = vmatprep.mubr.msk.bf16.mxu0 %vm1424_vm1, %v1423_v8  ;;  %1262 = vmatpush3.bf16.msra.mxu0 %v1335_v41 }
 0xa33   : > { %1263 = vmatprep.subr.bf16.mxu0 %v1423_v8 }
 0xa36   : > { %1264 = vmatpush3.bf16.msra.mxu0 %v1336_v42 }
 0xa37   : > { %1265 = vmatprep.subr.bf16.mxu0 %v1423_v8 }
 0xa3a   : > { %1266 = vmatpush3.bf16.msra.mxu0 %v1337_v43 }
 0xa3b   : > { %1267 = vmatprep.subr.bf16.mxu0 %v1423_v8 }
 0xa3e   : > { %1268 = vmatpush3.bf16.msra.mxu0 %v1338_v44 }
 0xa3f   : > { %1269 = vmatprep.subr.bf16.mxu0 %v1423_v8 }
 0xa42   : > { %1270 = vmatpush3.bf16.msra.mxu0 %v1339_v45 }
 0xa43   : > { %1271 = vmatprep.subr.bf16.mxu0 %v1423_v8 }
 0xa46   : > { %1272 = vmatpush3.bf16.msra.mxu0 %v1340_v46 }
 0xa47   : > { %1273 = vmatprep.subr.bf16.mxu0 %v1423_v8 }
 0xa4a   : > { %1274 = vmatpush3.bf16.msra.mxu0 %v1341_v47 }
 0xa4b   : > { %1275 = vmatprep.subr.bf16.mxu0 %v1423_v8 }
 0xa4e   : > { %1276 = vmatpush3.bf16.msra.mxu0 %v1342_v48 }
 0xb04   : > { %v939_v50 = vpop.f32.mrb[4].mxu0 }
 0xb05   : > { %v940_v51 = vadd.f32 %v1163_v49, %v939_v50  ;;  %v1259_v52 = vpop.f32.mrb[5].mxu0 }
 0xb06   : > { %v942_v53 = vpop.f32.mrb[6].mxu0 }
 0xb07   : > { %v1167_v54 = vmul.f32 -1.442695, %v940_v51  ;;  %v1260_v55 = vpop.f32.mrb[7].mxu0 }
 0xb09   : > { %1355 = vpow2.f32 %v1167_v54 }
 0xb13   : > { %v1356_v56 = vpop.eup %1355 }
 0xb14   : > { %v948_v8 = vadd.f32 1.0, %v1356_v56 }
 0xb16   : > { %1357 = vrcp.f32 %v948_v8 }
 0xb20   : > { %v1358_v57 = vpop.eup %1357 }
 0xb21   : > { %v951_v58 = vmul.f32 %v1358_v57, %v940_v51 }
 0xb23   : > { %v952_v59 = vpack.c.bf16 %v951_v58, %v951_v58 }
 0xb25   : > { %1278 = vmatmul.mubr.bf16.vlgmr.msra.gmra.mrb[8].mxu0 %v952_v59 }
 0xbf8   : > { %v1058_v61 = vpop.f32.mrb[8].mxu0 }
 0xbf9   : > { %v1059_v62 = vadd.f32 %v1168_v60, %v1058_v61  ;;  %v1279_v63 = vpop.f32.mrb[9].mxu0 }
 0xbfa   : > { %v1061_v1 = vpop.f32.mrb[10].mxu0 }
 0xbfb   : > { %v1064_v2 = vadd.f32 %v1059_v62, %v1632_v22  ;;  %v1280_v3 = vpop.f32.mrb[11].mxu0 }
 0xbfd   : > { %1065 = vst.msk [vmem:[%s431_s15] sm:$0xff] %vm440_vm0, %v1064_v2 }
 0xbfe   : > { %1372 = shalt.err (!%p1369_p3)
}
 0xbff   : > { %s1373_s0 = scalar_lea.hbm %s1698_s1, 128  ;;  %s1377_s15 = scalar_lea.hbm %s1754_s13, 256 }
 0xc00   : > { %p1374_p4 = scmp.ne.s32.totalorder %s1698_s1, %s1373_s0  ;;  %p1378_p9 = scmp.lt.u32.totalorder %s1698_s1, %s1754_s13 }
 0xc01   : > { %p1379_p10 = scmp.lt.u32.totalorder %s1377_s15, %s1373_s0  ;;  %p1381_p12 = scmp.lt.u32.totalorder %s1373_s0, %s1698_s1 }
 0xc02   : > { %p1375_p7 = pnand %p1374_p4, %p1539_p5 }
 0xc03   : > { %p1380_p11 = por %p1379_p10, %p1378_p9 }
 0xc04   : > { %p1376_p8 = pneg %p1375_p7 }
 0xc05   : > { %p1382_p13 = por %p1381_p12, %p1380_p11 }
 0xc07   : > { %p1383_p0 = pnand %p1382_p13, %p1376_p8 }
 0xc09   : > { %1386 = shalt.err (!%p1383_p0)
}
 0xc0a   : > { %1281 = dma.vmem_to_hbm [thread:$0]  (%p1539_p5), %s1700_s23, 128, %s1698_s1, %s1067_s29  }
 0xc0b PF: > { %p1287_p1 = scmp.ge.s32.totalorder %s1421_s28, 2  ;;  %s1092_s2 = sand.u32 1, %s1409_s25  }
 0xc0c   : > { %s1093_s21 = scalar_lea.sflag [#allocation3], %s1092_s2 }
 0xc0d   : > { %p1284_p2 = pnand %p1287_p1, %p1543_p6 }
 0xc0f   : > { %1404 = dma.done.wait (!%p1284_p2), %s1093_s21, 128  }
 0xc10   : > { %1406 = vsyncadd (!%p1284_p2), %s1093_s21, 4294967168  ;;  %p23_p3 = scmp.ge.s32.totalorder %s1526_s14, 4   ;;  %s1763_s25 = smov %s1413_s26 }
 0xc11   : > { %s1764_s26 = smov %s1417_s27  ;;  %s1765_s27 = smov %s1537_s17 }
 0xc12   : > { %s1766_s28 = smov %s1526_s14  ;;  %25 = sbr.rel (!%p23_p3) target bundleno = 7 (0x7), region = 107 }
 0xc19   :  { %1098 = vsyncpa [#allocation3], 1 }
 0xc1a   :  { %1100 = vsyncpa [#allocation3 + $0x1], 1 }

</bundles_post_ra>
